<compile_context>
chip_gen: v6e
topology: v6e:2x2x1
jax: 0.10.0
libtpu: 0.0.40
codegen_flags: <defaults>
</compile_context>

<pallas_src>
import jax
import jax.numpy as jnp
import numpy as np
from jax.experimental import pallas as pl
from jax.experimental.pallas import tpu as pltpu

PADDING = 0

# --- config (RNN_Encoder(source_vocab_size=VOCAB, rnn_hidden_size=HID,
#              embedding_size=EMB, num_rnn_layers=NUM_LAYERS,
#              dropout_rate=0.0, bidirectional=False, rnn_type='lstm')) ---
VOCAB = 16
EMB = 32
HID = 32
NUM_LAYERS = 2
B = 2
T = 8

assert NUM_LAYERS >= 2

# TODO(synk): training-mode nn.Dropout not implemented; eval-mode identity used.


def _fused_lstm_kernel(lens_ref, x_ref, wih0_ref, whh0_ref, b0_ref,
                       wihL_ref, whhL_ref, bL_ref,
                       out_ref, hn_ref, cn_ref,
                       gx_ref):
    """Fused multi-layer LSTM over the whole sequence (single invocation).

    lens_ref : (B, 1)  int32    sequence lengths (padded batch rows have 0)
    x_ref    : (T*B, E)         time-major embedded inputs, flattened (T,B)
    wih0_ref : (E, 4H)          layer-0 input weights  (gate order i,f,g,o)
    whh0_ref : (H, 4H)          layer-0 recurrent weights
    b0_ref   : (1, 4H)          layer-0 bias (b_ih + b_hh)
    wihL_ref : (L-1, H, 4H)     layers>=1 input weights
    whhL_ref : (L-1, H, 4H)     layers>=1 recurrent weights
    bL_ref   : (L-1, 1, 4H)     layers>=1 bias (b_ih + b_hh)
    out_ref  : (T, B, H)        last-layer per-step output (0 on padding)
    hn_ref   : (L, B, H)        final hidden states (written once)
    cn_ref   : (L, B, H)        final cell states   (written once)
    gx_ref   : (T, B, 4H)       VMEM scratch: hoisted layer-0 input projection
    """
    Tn, Bn, Hn = out_ref.shape
    Ln = hn_ref.shape[0]

    # ---- prologue: layer-0 input projection off the serial critical path ----
    gx = (jnp.dot(x_ref[...], wih0_ref[...],
                  preferred_element_type=jnp.float32) + b0_ref[...])
    gx_ref[...] = gx.reshape(Tn, Bn, 4 * Hn)

    # ---- hoist every time-invariant load out of the time loop --------------
    lens = lens_ref[...]                       # (B, 1) int32, loaded once
    whh0 = whh0_ref[...]                       # (H, 4H)
    wihL = [wihL_ref[l] for l in range(Ln - 1)]    # (H, 4H) each
    whhL = [whhL_ref[l] for l in range(Ln - 1)]    # (H, 4H) each
    bL = [bL_ref[l] for l in range(Ln - 1)]        # (1, 4H) each

    def lstm_cell(gates, c_old):
        # Lane-dense nonlinearities over all 4H lanes, then static slices.
        sg = jax.nn.sigmoid(gates)
        th = jnp.tanh(gates)
        i = sg[:, 0:Hn]
        f = sg[:, Hn:2 * Hn]
        g = th[:, 2 * Hn:3 * Hn]
        o = sg[:, 3 * Hn:4 * Hn]
        c_new = f * c_old + i * g
        h_new = o * jnp.tanh(c_new)
        return h_new, c_new

    # ---- recurrent state carried purely in vregs ----------------------------
    h = [jnp.zeros((Bn, Hn), jnp.float32) for _ in range(Ln)]
    c = [jnp.zeros((Bn, Hn), jnp.float32) for _ in range(Ln)]
    outs = []

    for t in range(Tn):                         # static unroll; T is small
        mask = t < lens                         # (B, 1) bool

        # ---- layer 0: only the recurrent matmul remains on the serial path
        gates0 = gx_ref[t] + jnp.dot(h[0], whh0,
                                     preferred_element_type=jnp.float32)
        h_new, c_new = lstm_cell(gates0, c[0])
        h[0] = jnp.where(mask, h_new, h[0])     # freeze past seq end
        c[0] = jnp.where(mask, c_new, c[0])
        x_l = h_new                             # input to next layer

        # ---- layers 1..L-1: two small dots (no lane-axis concat) ------------
        for l in range(1, Ln):
            gates = (jnp.dot(x_l, wihL[l - 1],
                             preferred_element_type=jnp.float32)
                     + jnp.dot(h[l], whhL[l - 1],
                               preferred_element_type=jnp.float32)
                     + bL[l - 1])
            h_new, c_new = lstm_cell(gates, c[l])
            h[l] = jnp.where(mask, h_new, h[l])
            c[l] = jnp.where(mask, c_new, c[l])
            x_l = h_new

        outs.append(jnp.where(mask, x_l, 0.0))  # padding_value = 0

    # ---- single stacked writes (off the dependence chain) -------------------
    out_ref[...] = jnp.stack(outs, axis=0)
    hn_ref[...] = jnp.stack(h, axis=0)
    cn_ref[...] = jnp.stack(c, axis=0)


def _fused_lstm(lens, x2d, wih0, whh0, b0, wihL, whhL, bL, Tn, Bn):
    Hn = whh0.shape[0]
    Ln = wihL.shape[0] + 1
    vmem = pl.BlockSpec(memory_space=pltpu.MemorySpace.VMEM)
    return pl.pallas_call(
        _fused_lstm_kernel,
        out_shape=(
            jax.ShapeDtypeStruct((Tn, Bn, Hn), jnp.float32),   # per-step output
            jax.ShapeDtypeStruct((Ln, Bn, Hn), jnp.float32),   # h_n
            jax.ShapeDtypeStruct((Ln, Bn, Hn), jnp.float32),   # c_n
        ),
        in_specs=[vmem] * 8,
        out_specs=(vmem, vmem, vmem),
        scratch_shapes=[pltpu.VMEM((Tn, Bn, 4 * Hn), jnp.float32)],
        compiler_params=pltpu.CompilerParams(
            vmem_limit_bytes=32 * 1024 * 1024),
    )(lens, x2d, wih0, whh0, b0, wihL, whhL, bL)


def init_params(key):
    keys = jax.random.split(key, 1 + NUM_LAYERS)
    emb = jax.random.normal(keys[0], (VOCAB, EMB), jnp.float32)
    emb = emb.at[PADDING].set(0.0)            # nn.Embedding(padding_idx=0)
    k = 1.0 / np.sqrt(HID)

    def layer(lkey, in_size):
        k1, k2, k3, k4 = jax.random.split(lkey, 4)
        w_ih = jax.random.uniform(k1, (4 * HID, in_size), jnp.float32, -k, k)
        w_hh = jax.random.uniform(k2, (4 * HID, HID), jnp.float32, -k, k)
        b_ih = jax.random.uniform(k3, (4 * HID,), jnp.float32, -k, k)
        b_hh = jax.random.uniform(k4, (4 * HID,), jnp.float32, -k, k)
        return w_ih.T, w_hh.T, (b_ih + b_hh)[None, :]

    wih0, whh0, b0 = layer(keys[1], EMB)
    wihL, whhL, bL = [], [], []
    for l in range(1, NUM_LAYERS):
        wih, whh, b = layer(keys[1 + l], HID)
        wihL.append(wih)                       # (H, 4H)
        whhL.append(whh)                       # (H, 4H)
        bL.append(b)                           # (1, 4H)
    return {
        "embedding": emb,
        "wih0": wih0, "whh0": whh0, "b0": b0,
        "wihL": jnp.stack(wihL, axis=0),       # (L-1, H, 4H)
        "whhL": jnp.stack(whhL, axis=0),       # (L-1, H, 4H)
        "bL": jnp.stack(bL, axis=0),           # (L-1, 1, 4H)
    }


def rnn_encoder_forward(params, padded_src, src_lens):
    Bn, Tn = padded_src.shape
    # Pad batch to a multiple of 8 (full sublanes); padded rows have len=0,
    # embed to zeros, stay frozen at zero state, and are sliced off below.
    B_pad = ((Bn + 7) // 8) * 8
    pad = B_pad - Bn
    src_p = jnp.pad(padded_src, ((0, pad), (0, 0)), constant_values=PADDING)
    lens_p = jnp.pad(src_lens.astype(jnp.int32), ((0, pad),),
                     constant_values=0)

    emb = params["embedding"][src_p]                               # (Bp, T, E)
    # nn.Dropout in eval mode is identity.
    E = emb.shape[-1]
    x2d = jnp.transpose(emb, (1, 0, 2)).reshape(Tn * B_pad, E)     # time-major
    x2d = x2d.astype(jnp.float32)
    lens = lens_p.reshape(B_pad, 1)                                # (Bp, 1)

    out_tbh, h_n, c_n = _fused_lstm(lens, x2d, params["wih0"], params["whh0"],
                                    params["b0"], params["wihL"],
                                    params["whhL"], params["bL"], Tn, B_pad)
    padded_output = jnp.transpose(out_tbh, (1, 0, 2))[:Bn]         # (B, T, H)
    # pad_packed_sequence pads only up to max(src_lens); padded positions are
    # already 0, so we return full T and avoid a device->host sync. The caller
    # can slice with a static max_len if the shorter shape is required.
    return padded_output, (h_n[:, :Bn], c_n[:, :Bn])


# ---------------- pure-JAX reference (lax.scan) for verification ----------------
def rnn_encoder_forward_ref(params, padded_src, src_lens):
    Bn, Tn = padded_src.shape
    Hn = HID
    emb = params["embedding"][padded_src]                        # (B, T, E)
    x = jnp.transpose(emb, (1, 0, 2)).astype(jnp.float32)        # (T, B, E)
    mask = (jnp.arange(Tn)[:, None] < src_lens[None, :])[:, :, None]  # (T,B,1)

    def cell(gates, c):
        i = jax.nn.sigmoid(gates[:, :Hn])
        f = jax.nn.sigmoid(gates[:, Hn:2 * Hn])
        g = jnp.tanh(gates[:, 2 * Hn:3 * Hn])
        o = jax.nn.sigmoid(gates[:, 3 * Hn:])
        c_new = f * c + i * g
        return o * jnp.tanh(c_new), c_new

    zeros = jnp.zeros((Bn, Hn), jnp.float32)

    # layer 0 (hoisted input projection, same association as the kernel)
    gx = jnp.einsum("tbe,ef->tbf", x, params["wih0"]) + params["b0"]

    def step0(carry, inp):
        h, c = carry
        g_in, m = inp
        gates = g_in + h @ params["whh0"]
        h_new, c_new = cell(gates, c)
        return (jnp.where(m, h_new, h), jnp.where(m, c_new, c)), h_new

    (h0, c0), out0 = jax.lax.scan(step0, (zeros, zeros), (gx, mask))
    h_list, c_list = [h0], [c0]
    layer_in = out0

    for l in range(1, NUM_LAYERS):
        wih = params["wihL"][l - 1]
        whh = params["whhL"][l - 1]
        bc = params["bL"][l - 1]

        def stepl(carry, inp, wih=wih, whh=whh, bc=bc):
            h, c = carry
            x_t, m = inp
            gates = x_t @ wih + h @ whh + bc
            h_new, c_new = cell(gates, c)
            return (jnp.where(m, h_new, h), jnp.where(m, c_new, c)), h_new

        (hl, cl), outl = jax.lax.scan(stepl, (zeros, zeros), (layer_in, mask))
        h_list.append(hl)
        c_list.append(cl)
        layer_in = outl

    out = jnp.where(mask, layer_in, 0.0)                         # zero padding
    padded_output = jnp.transpose(out, (1, 0, 2))                # (B, T, H)
    return padded_output, (jnp.stack(h_list), jnp.stack(c_list))


if __name__ == "__main__":
    key = jax.random.PRNGKey(0)
    pkey, dkey = jax.random.split(key)
    params = init_params(pkey)

    padded_src = jax.random.randint(dkey, (B, T), 1, VOCAB, dtype=jnp.int32)
    src_lens = jnp.array([T, 5], dtype=jnp.int32)
    pos = jnp.arange(T)[None, :]
    padded_src = jnp.where(pos < src_lens[:, None], padded_src, PADDING)

    fwd = jax.jit(rnn_encoder_forward)
    padded_output, (h_n, c_n) = fwd(params, padded_src, src_lens)
    jax.block_until_ready((padded_output, h_n, c_n))

    ref_out, (ref_h, ref_c) = rnn_encoder_forward_ref(params, padded_src, src_lens)
    np.testing.assert_allclose(np.asarray(padded_output), np.asarray(ref_out),
                               rtol=1e-4, atol=1e-4)
    np.testing.assert_allclose(np.asarray(h_n), np.asarray(ref_h),
                               rtol=1e-4, atol=1e-4)
    np.testing.assert_allclose(np.asarray(c_n), np.asarray(ref_c),
                               rtol=1e-4, atol=1e-4)

    print("KERNEL_OK")
</pallas_src>

<mosaic_0001>
module attributes {stable_mosaic.version = 11 : i64} {
  func.func @_fused_lstm_kernel(%arg0: memref<8x1xi32, #tpu.memory_space<vmem>>, %arg1: memref<64x32xf32, #tpu.memory_space<vmem>>, %arg2: memref<32x128xf32, #tpu.memory_space<vmem>>, %arg3: memref<32x128xf32, #tpu.memory_space<vmem>>, %arg4: memref<1x128xf32, #tpu.memory_space<vmem>>, %arg5: memref<1x32x128xf32, #tpu.memory_space<vmem>>, %arg6: memref<1x32x128xf32, #tpu.memory_space<vmem>>, %arg7: memref<1x1x128xf32, #tpu.memory_space<vmem>>, %arg8: memref<8x8x32xf32, #tpu.memory_space<vmem>>, %arg9: memref<2x8x32xf32, #tpu.memory_space<vmem>>, %arg10: memref<2x8x32xf32, #tpu.memory_space<vmem>>, %arg11: memref<8x8x128xf32, #tpu.memory_space<vmem>>) attributes {dimension_semantics = [], scalar_prefetch = 0 : i64, scratch_operands = 1 : i64, tpu.core_type = #tpu.core_type<tc>} {
    %c0 = arith.constant 0 : index
    %c0_0 = arith.constant 0 : index
    %0 = vector.load %arg1[%c0, %c0_0] : memref<64x32xf32, #tpu.memory_space<vmem>>, vector<64x32xf32>
    %c0_1 = arith.constant 0 : index
    %c0_2 = arith.constant 0 : index
    %1 = vector.load %arg2[%c0_1, %c0_2] : memref<32x128xf32, #tpu.memory_space<vmem>>, vector<32x128xf32>
    %cst = arith.constant dense<0.000000e+00> : vector<64x128xf32>
    %2 = tpu.matmul %0, %1, %cst {dimension_numbers = #tpu.dot_dimension_numbers<[1], [0], [0], [1], [0, 0, 1, 1], [], []>} : vector<64x32xf32>, vector<32x128xf32>, vector<64x128xf32> -> vector<64x128xf32>
    %c0_3 = arith.constant 0 : index
    %c0_4 = arith.constant 0 : index
    %3 = vector.load %arg4[%c0_3, %c0_4] : memref<1x128xf32, #tpu.memory_space<vmem>>, vector<1x128xf32>
    %4 = vector.broadcast %3 : vector<1x128xf32> to vector<64x128xf32>
    %5 = arith.addf %2, %4 : vector<64x128xf32>
    %6 = vector.shape_cast %5 : vector<64x128xf32> to vector<8x8x128xf32>
    %c0_5 = arith.constant 0 : index
    %c0_6 = arith.constant 0 : index
    %c0_7 = arith.constant 0 : index
    %7 = vector.load %arg11[%c0_5, %c0_6, %c0_7] : memref<8x8x128xf32, #tpu.memory_space<vmem>>, vector<8x8x128xf32>
    tpu.vector_store %arg11[%c0_5, %c0_6, %c0_7], %6 {strides = array<i32>} : memref<8x8x128xf32, #tpu.memory_space<vmem>>, vector<8x8x128xf32>,
    %c0_8 = arith.constant 0 : index
    %c0_9 = arith.constant 0 : index
    %8 = vector.load %arg0[%c0_8, %c0_9] : memref<8x1xi32, #tpu.memory_space<vmem>>, vector<8x1xi32>
    %c0_10 = arith.constant 0 : index
    %c0_11 = arith.constant 0 : index
    %9 = vector.load %arg3[%c0_10, %c0_11] : memref<32x128xf32, #tpu.memory_space<vmem>>, vector<32x128xf32>
    %c0_12 = arith.constant 0 : index
    %c0_13 = arith.constant 0 : index
    %c0_14 = arith.constant 0 : index
    %10 = vector.load %arg5[%c0_12, %c0_13, %c0_14] : memref<1x32x128xf32, #tpu.memory_space<vmem>>, vector<1x32x128xf32>
    %11 = vector.shape_cast %10 : vector<1x32x128xf32> to vector<32x128xf32>
    %c0_15 = arith.constant 0 : index
    %c0_16 = arith.constant 0 : index
    %c0_17 = arith.constant 0 : index
    %12 = vector.load %arg6[%c0_15, %c0_16, %c0_17] : memref<1x32x128xf32, #tpu.memory_space<vmem>>, vector<1x32x128xf32>
    %13 = vector.shape_cast %12 : vector<1x32x128xf32> to vector<32x128xf32>
    %c0_18 = arith.constant 0 : index
    %c0_19 = arith.constant 0 : index
    %c0_20 = arith.constant 0 : index
    %14 = vector.load %arg7[%c0_18, %c0_19, %c0_20] : memref<1x1x128xf32, #tpu.memory_space<vmem>>, vector<1x1x128xf32>
    %15 = vector.shape_cast %14 : vector<1x1x128xf32> to vector<1x128xf32>
    %cst_21 = arith.constant 0.000000e+00 : f32
    %16 = vector.broadcast %cst_21 : f32 to vector<8x32xf32>
    %cst_22 = arith.constant 0.000000e+00 : f32
    %17 = vector.broadcast %cst_22 : f32 to vector<8x32xf32>
    %cst_23 = arith.constant 0.000000e+00 : f32
    %18 = vector.broadcast %cst_23 : f32 to vector<8x32xf32>
    %cst_24 = arith.constant 0.000000e+00 : f32
    %19 = vector.broadcast %cst_24 : f32 to vector<8x32xf32>
    %c0_i32 = arith.constant 0 : i32
    %20 = vector.broadcast %c0_i32 : i32 to vector<8x1xi32>
    %21 = arith.cmpi sgt, %8, %20 : vector<8x1xi32>
    %c0_25 = arith.constant 0 : index
    %c0_26 = arith.constant 0 : index
    %c0_27 = arith.constant 0 : index
    %22 = vector.load %arg11[%c0_25, %c0_26, %c0_27] : memref<8x8x128xf32, #tpu.memory_space<vmem>>, vector<1x8x128xf32>
    %23 = vector.shape_cast %22 : vector<1x8x128xf32> to vector<8x128xf32>
    %cst_28 = arith.constant dense<0.000000e+00> : vector<8x128xf32>
    %24 = tpu.matmul %16, %9, %cst_28 {dimension_numbers = #tpu.dot_dimension_numbers<[1], [0], [0], [1], [0, 0, 1, 1], [], []>} : vector<8x32xf32>, vector<32x128xf32>, vector<8x128xf32> -> vector<8x128xf32>
    %25 = arith.addf %23, %24 : vector<8x128xf32>
    %26 = arith.negf %25 : vector<8x128xf32>
    %27 = math.exp %26 : vector<8x128xf32>
    %cst_29 = arith.constant 1.000000e+00 : f32
    %28 = vector.broadcast %cst_29 : f32 to vector<8x128xf32>
    %29 = arith.addf %28, %27 : vector<8x128xf32>
    %30 = arith.divf %28, %29 : vector<8x128xf32>
    %31 = math.tanh %25 : vector<8x128xf32>
    %32 = vector.extract_strided_slice %30 {offsets = [0, 0], sizes = [8, 32], strides = [1, 1]} : vector<8x128xf32> to vector<8x32xf32>
    %33 = vector.extract_strided_slice %30 {offsets = [0, 32], sizes = [8, 32], strides = [1, 1]} : vector<8x128xf32> to vector<8x32xf32>
    %34 = vector.extract_strided_slice %31 {offsets = [0, 64], sizes = [8, 32], strides = [1, 1]} : vector<8x128xf32> to vector<8x32xf32>
    %35 = vector.extract_strided_slice %30 {offsets = [0, 96], sizes = [8, 32], strides = [1, 1]} : vector<8x128xf32> to vector<8x32xf32>
    %36 = arith.mulf %33, %18 : vector<8x32xf32>
    %37 = arith.mulf %32, %34 : vector<8x32xf32>
    %38 = arith.addf %36, %37 : vector<8x32xf32>
    %39 = math.tanh %38 : vector<8x32xf32>
    %40 = arith.mulf %35, %39 : vector<8x32xf32>
    %41 = vector.shape_cast %21 : vector<8x1xi1> to vector<8x1xi1>
    %42 = vector.broadcast %41 : vector<8x1xi1> to vector<8x32xi1>
    %43 = arith.select %42, %40, %16 : vector<8x32xi1>, vector<8x32xf32>
    %44 = vector.shape_cast %21 : vector<8x1xi1> to vector<8x1xi1>
    %45 = vector.broadcast %44 : vector<8x1xi1> to vector<8x32xi1>
    %46 = arith.select %45, %38, %18 : vector<8x32xi1>, vector<8x32xf32>
    %cst_30 = arith.constant dense<0.000000e+00> : vector<8x128xf32>
    %47 = tpu.matmul %40, %11, %cst_30 {dimension_numbers = #tpu.dot_dimension_numbers<[1], [0], [0], [1], [0, 0, 1, 1], [], []>} : vector<8x32xf32>, vector<32x128xf32>, vector<8x128xf32> -> vector<8x128xf32>
    %cst_31 = arith.constant dense<0.000000e+00> : vector<8x128xf32>
    %48 = tpu.matmul %17, %13, %cst_31 {dimension_numbers = #tpu.dot_dimension_numbers<[1], [0], [0], [1], [0, 0, 1, 1], [], []>} : vector<8x32xf32>, vector<32x128xf32>, vector<8x128xf32> -> vector<8x128xf32>
    %49 = arith.addf %47, %48 : vector<8x128xf32>
    %50 = vector.broadcast %15 : vector<1x128xf32> to vector<8x128xf32>
    %51 = arith.addf %49, %50 : vector<8x128xf32>
    %52 = arith.negf %51 : vector<8x128xf32>
    %53 = math.exp %52 : vector<8x128xf32>
    %cst_32 = arith.constant 1.000000e+00 : f32
    %54 = vector.broadcast %cst_32 : f32 to vector<8x128xf32>
    %55 = arith.addf %54, %53 : vector<8x128xf32>
    %56 = arith.divf %54, %55 : vector<8x128xf32>
    %57 = math.tanh %51 : vector<8x128xf32>
    %58 = vector.extract_strided_slice %56 {offsets = [0, 0], sizes = [8, 32], strides = [1, 1]} : vector<8x128xf32> to vector<8x32xf32>
    %59 = vector.extract_strided_slice %56 {offsets = [0, 32], sizes = [8, 32], strides = [1, 1]} : vector<8x128xf32> to vector<8x32xf32>
    %60 = vector.extract_strided_slice %57 {offsets = [0, 64], sizes = [8, 32], strides = [1, 1]} : vector<8x128xf32> to vector<8x32xf32>
    %61 = vector.extract_strided_slice %56 {offsets = [0, 96], sizes = [8, 32], strides = [1, 1]} : vector<8x128xf32> to vector<8x32xf32>
    %62 = arith.mulf %59, %19 : vector<8x32xf32>
    %63 = arith.mulf %58, %60 : vector<8x32xf32>
    %64 = arith.addf %62, %63 : vector<8x32xf32>
    %65 = math.tanh %64 : vector<8x32xf32>
    %66 = arith.mulf %61, %65 : vector<8x32xf32>
    %67 = vector.shape_cast %21 : vector<8x1xi1> to vector<8x1xi1>
    %68 = vector.broadcast %67 : vector<8x1xi1> to vector<8x32xi1>
    %69 = arith.select %68, %66, %17 : vector<8x32xi1>, vector<8x32xf32>
    %70 = vector.shape_cast %21 : vector<8x1xi1> to vector<8x1xi1>
    %71 = vector.broadcast %70 : vector<8x1xi1> to vector<8x32xi1>
    %72 = arith.select %71, %64, %19 : vector<8x32xi1>, vector<8x32xf32>
    %cst_33 = arith.constant 0.000000e+00 : f32
    %73 = vector.shape_cast %21 : vector<8x1xi1> to vector<8x1xi1>
    %74 = vector.broadcast %73 : vector<8x1xi1> to vector<8x32xi1>
    %75 = vector.broadcast %cst_33 : f32 to vector<8x32xf32>
    %76 = arith.select %74, %66, %75 : vector<8x32xi1>, vector<8x32xf32>
    %c1_i32 = arith.constant 1 : i32
    %77 = vector.broadcast %c1_i32 : i32 to vector<8x1xi32>
    %78 = arith.cmpi sgt, %8, %77 : vector<8x1xi32>
    %c1 = arith.constant 1 : index
    %c0_34 = arith.constant 0 : index
    %c0_35 = arith.constant 0 : index
    %79 = vector.load %arg11[%c1, %c0_34, %c0_35] : memref<8x8x128xf32, #tpu.memory_space<vmem>>, vector<1x8x128xf32>
    %80 = vector.shape_cast %79 : vector<1x8x128xf32> to vector<8x128xf32>
    %cst_36 = arith.constant dense<0.000000e+00> : vector<8x128xf32>
    %81 = tpu.matmul %43, %9, %cst_36 {dimension_numbers = #tpu.dot_dimension_numbers<[1], [0], [0], [1], [0, 0, 1, 1], [], []>} : vector<8x32xf32>, vector<32x128xf32>, vector<8x128xf32> -> vector<8x128xf32>
    %82 = arith.addf %80, %81 : vector<8x128xf32>
    %83 = arith.negf %82 : vector<8x128xf32>
    %84 = math.exp %83 : vector<8x128xf32>
    %cst_37 = arith.constant 1.000000e+00 : f32
    %85 = vector.broadcast %cst_37 : f32 to vector<8x128xf32>
    %86 = arith.addf %85, %84 : vector<8x128xf32>
    %87 = arith.divf %85, %86 : vector<8x128xf32>
    %88 = math.tanh %82 : vector<8x128xf32>
    %89 = vector.extract_strided_slice %87 {offsets = [0, 0], sizes = [8, 32], strides = [1, 1]} : vector<8x128xf32> to vector<8x32xf32>
    %90 = vector.extract_strided_slice %87 {offsets = [0, 32], sizes = [8, 32], strides = [1, 1]} : vector<8x128xf32> to vector<8x32xf32>
    %91 = vector.extract_strided_slice %88 {offsets = [0, 64], sizes = [8, 32], strides = [1, 1]} : vector<8x128xf32> to vector<8x32xf32>
    %92 = vector.extract_strided_slice %87 {offsets = [0, 96], sizes = [8, 32], strides = [1, 1]} : vector<8x128xf32> to vector<8x32xf32>
    %93 = arith.mulf %90, %46 : vector<8x32xf32>
    %94 = arith.mulf %89, %91 : vector<8x32xf32>
    %95 = arith.addf %93, %94 : vector<8x32xf32>
    %96 = math.tanh %95 : vector<8x32xf32>
    %97 = arith.mulf %92, %96 : vector<8x32xf32>
    %98 = vector.shape_cast %78 : vector<8x1xi1> to vector<8x1xi1>
    %99 = vector.broadcast %98 : vector<8x1xi1> to vector<8x32xi1>
    %100 = arith.select %99, %97, %43 : vector<8x32xi1>, vector<8x32xf32>
    %101 = vector.shape_cast %78 : vector<8x1xi1> to vector<8x1xi1>
    %102 = vector.broadcast %101 : vector<8x1xi1> to vector<8x32xi1>
    %103 = arith.select %102, %95, %46 : vector<8x32xi1>, vector<8x32xf32>
    %cst_38 = arith.constant dense<0.000000e+00> : vector<8x128xf32>
    %104 = tpu.matmul %97, %11, %cst_38 {dimension_numbers = #tpu.dot_dimension_numbers<[1], [0], [0], [1], [0, 0, 1, 1], [], []>} : vector<8x32xf32>, vector<32x128xf32>, vector<8x128xf32> -> vector<8x128xf32>
    %cst_39 = arith.constant dense<0.000000e+00> : vector<8x128xf32>
    %105 = tpu.matmul %69, %13, %cst_39 {dimension_numbers = #tpu.dot_dimension_numbers<[1], [0], [0], [1], [0, 0, 1, 1], [], []>} : vector<8x32xf32>, vector<32x128xf32>, vector<8x128xf32> -> vector<8x128xf32>
    %106 = arith.addf %104, %105 : vector<8x128xf32>
    %107 = vector.broadcast %15 : vector<1x128xf32> to vector<8x128xf32>
    %108 = arith.addf %106, %107 : vector<8x128xf32>
    %109 = arith.negf %108 : vector<8x128xf32>
    %110 = math.exp %109 : vector<8x128xf32>
    %cst_40 = arith.constant 1.000000e+00 : f32
    %111 = vector.broadcast %cst_40 : f32 to vector<8x128xf32>
    %112 = arith.addf %111, %110 : vector<8x128xf32>
    %113 = arith.divf %111, %112 : vector<8x128xf32>
    %114 = math.tanh %108 : vector<8x128xf32>
    %115 = vector.extract_strided_slice %113 {offsets = [0, 0], sizes = [8, 32], strides = [1, 1]} : vector<8x128xf32> to vector<8x32xf32>
    %116 = vector.extract_strided_slice %113 {offsets = [0, 32], sizes = [8, 32], strides = [1, 1]} : vector<8x128xf32> to vector<8x32xf32>
    %117 = vector.extract_strided_slice %114 {offsets = [0, 64], sizes = [8, 32], strides = [1, 1]} : vector<8x128xf32> to vector<8x32xf32>
    %118 = vector.extract_strided_slice %113 {offsets = [0, 96], sizes = [8, 32], strides = [1, 1]} : vector<8x128xf32> to vector<8x32xf32>
    %119 = arith.mulf %116, %72 : vector<8x32xf32>
    %120 = arith.mulf %115, %117 : vector<8x32xf32>
    %121 = arith.addf %119, %120 : vector<8x32xf32>
    %122 = math.tanh %121 : vector<8x32xf32>
    %123 = arith.mulf %118, %122 : vector<8x32xf32>
    %124 = vector.shape_cast %78 : vector<8x1xi1> to vector<8x1xi1>
    %125 = vector.broadcast %124 : vector<8x1xi1> to vector<8x32xi1>
    %126 = arith.select %125, %123, %69 : vector<8x32xi1>, vector<8x32xf32>
    %127 = vector.shape_cast %78 : vector<8x1xi1> to vector<8x1xi1>
    %128 = vector.broadcast %127 : vector<8x1xi1> to vector<8x32xi1>
    %129 = arith.select %128, %121, %72 : vector<8x32xi1>, vector<8x32xf32>
    %cst_41 = arith.constant 0.000000e+00 : f32
    %130 = vector.shape_cast %78 : vector<8x1xi1> to vector<8x1xi1>
    %131 = vector.broadcast %130 : vector<8x1xi1> to vector<8x32xi1>
    %132 = vector.broadcast %cst_41 : f32 to vector<8x32xf32>
    %133 = arith.select %131, %123, %132 : vector<8x32xi1>, vector<8x32xf32>
    %c2_i32 = arith.constant 2 : i32
    %134 = vector.broadcast %c2_i32 : i32 to vector<8x1xi32>
    %135 = arith.cmpi sgt, %8, %134 : vector<8x1xi32>
    %c2 = arith.constant 2 : index
    %c0_42 = arith.constant 0 : index
    %c0_43 = arith.constant 0 : index
    %136 = vector.load %arg11[%c2, %c0_42, %c0_43] : memref<8x8x128xf32, #tpu.memory_space<vmem>>, vector<1x8x128xf32>
    %137 = vector.shape_cast %136 : vector<1x8x128xf32> to vector<8x128xf32>
    %cst_44 = arith.constant dense<0.000000e+00> : vector<8x128xf32>
    %138 = tpu.matmul %100, %9, %cst_44 {dimension_numbers = #tpu.dot_dimension_numbers<[1], [0], [0], [1], [0, 0, 1, 1], [], []>} : vector<8x32xf32>, vector<32x128xf32>, vector<8x128xf32> -> vector<8x128xf32>
    %139 = arith.addf %137, %138 : vector<8x128xf32>
    %140 = arith.negf %139 : vector<8x128xf32>
    %141 = math.exp %140 : vector<8x128xf32>
    %cst_45 = arith.constant 1.000000e+00 : f32
    %142 = vector.broadcast %cst_45 : f32 to vector<8x128xf32>
    %143 = arith.addf %142, %141 : vector<8x128xf32>
    %144 = arith.divf %142, %143 : vector<8x128xf32>
    %145 = math.tanh %139 : vector<8x128xf32>
    %146 = vector.extract_strided_slice %144 {offsets = [0, 0], sizes = [8, 32], strides = [1, 1]} : vector<8x128xf32> to vector<8x32xf32>
    %147 = vector.extract_strided_slice %144 {offsets = [0, 32], sizes = [8, 32], strides = [1, 1]} : vector<8x128xf32> to vector<8x32xf32>
    %148 = vector.extract_strided_slice %145 {offsets = [0, 64], sizes = [8, 32], strides = [1, 1]} : vector<8x128xf32> to vector<8x32xf32>
    %149 = vector.extract_strided_slice %144 {offsets = [0, 96], sizes = [8, 32], strides = [1, 1]} : vector<8x128xf32> to vector<8x32xf32>
    %150 = arith.mulf %147, %103 : vector<8x32xf32>
    %151 = arith.mulf %146, %148 : vector<8x32xf32>
    %152 = arith.addf %150, %151 : vector<8x32xf32>
    %153 = math.tanh %152 : vector<8x32xf32>
    %154 = arith.mulf %149, %153 : vector<8x32xf32>
    %155 = vector.shape_cast %135 : vector<8x1xi1> to vector<8x1xi1>
    %156 = vector.broadcast %155 : vector<8x1xi1> to vector<8x32xi1>
    %157 = arith.select %156, %154, %100 : vector<8x32xi1>, vector<8x32xf32>
    %158 = vector.shape_cast %135 : vector<8x1xi1> to vector<8x1xi1>
    %159 = vector.broadcast %158 : vector<8x1xi1> to vector<8x32xi1>
    %160 = arith.select %159, %152, %103 : vector<8x32xi1>, vector<8x32xf32>
    %cst_46 = arith.constant dense<0.000000e+00> : vector<8x128xf32>
    %161 = tpu.matmul %154, %11, %cst_46 {dimension_numbers = #tpu.dot_dimension_numbers<[1], [0], [0], [1], [0, 0, 1, 1], [], []>} : vector<8x32xf32>, vector<32x128xf32>, vector<8x128xf32> -> vector<8x128xf32>
    %cst_47 = arith.constant dense<0.000000e+00> : vector<8x128xf32>
    %162 = tpu.matmul %126, %13, %cst_47 {dimension_numbers = #tpu.dot_dimension_numbers<[1], [0], [0], [1], [0, 0, 1, 1], [], []>} : vector<8x32xf32>, vector<32x128xf32>, vector<8x128xf32> -> vector<8x128xf32>
    %163 = arith.addf %161, %162 : vector<8x128xf32>
    %164 = vector.broadcast %15 : vector<1x128xf32> to vector<8x128xf32>
    %165 = arith.addf %163, %164 : vector<8x128xf32>
    %166 = arith.negf %165 : vector<8x128xf32>
    %167 = math.exp %166 : vector<8x128xf32>
    %cst_48 = arith.constant 1.000000e+00 : f32
    %168 = vector.broadcast %cst_48 : f32 to vector<8x128xf32>
    %169 = arith.addf %168, %167 : vector<8x128xf32>
    %170 = arith.divf %168, %169 : vector<8x128xf32>
    %171 = math.tanh %165 : vector<8x128xf32>
    %172 = vector.extract_strided_slice %170 {offsets = [0, 0], sizes = [8, 32], strides = [1, 1]} : vector<8x128xf32> to vector<8x32xf32>
    %173 = vector.extract_strided_slice %170 {offsets = [0, 32], sizes = [8, 32], strides = [1, 1]} : vector<8x128xf32> to vector<8x32xf32>
    %174 = vector.extract_strided_slice %171 {offsets = [0, 64], sizes = [8, 32], strides = [1, 1]} : vector<8x128xf32> to vector<8x32xf32>
    %175 = vector.extract_strided_slice %170 {offsets = [0, 96], sizes = [8, 32], strides = [1, 1]} : vector<8x128xf32> to vector<8x32xf32>
    %176 = arith.mulf %173, %129 : vector<8x32xf32>
    %177 = arith.mulf %172, %174 : vector<8x32xf32>
    %178 = arith.addf %176, %177 : vector<8x32xf32>
    %179 = math.tanh %178 : vector<8x32xf32>
    %180 = arith.mulf %175, %179 : vector<8x32xf32>
    %181 = vector.shape_cast %135 : vector<8x1xi1> to vector<8x1xi1>
    %182 = vector.broadcast %181 : vector<8x1xi1> to vector<8x32xi1>
    %183 = arith.select %182, %180, %126 : vector<8x32xi1>, vector<8x32xf32>
    %184 = vector.shape_cast %135 : vector<8x1xi1> to vector<8x1xi1>
    %185 = vector.broadcast %184 : vector<8x1xi1> to vector<8x32xi1>
    %186 = arith.select %185, %178, %129 : vector<8x32xi1>, vector<8x32xf32>
    %cst_49 = arith.constant 0.000000e+00 : f32
    %187 = vector.shape_cast %135 : vector<8x1xi1> to vector<8x1xi1>
    %188 = vector.broadcast %187 : vector<8x1xi1> to vector<8x32xi1>
    %189 = vector.broadcast %cst_49 : f32 to vector<8x32xf32>
    %190 = arith.select %188, %180, %189 : vector<8x32xi1>, vector<8x32xf32>
    %c3_i32 = arith.constant 3 : i32
    %191 = vector.broadcast %c3_i32 : i32 to vector<8x1xi32>
    %192 = arith.cmpi sgt, %8, %191 : vector<8x1xi32>
    %c3 = arith.constant 3 : index
    %c0_50 = arith.constant 0 : index
    %c0_51 = arith.constant 0 : index
    %193 = vector.load %arg11[%c3, %c0_50, %c0_51] : memref<8x8x128xf32, #tpu.memory_space<vmem>>, vector<1x8x128xf32>
    %194 = vector.shape_cast %193 : vector<1x8x128xf32> to vector<8x128xf32>
    %cst_52 = arith.constant dense<0.000000e+00> : vector<8x128xf32>
    %195 = tpu.matmul %157, %9, %cst_52 {dimension_numbers = #tpu.dot_dimension_numbers<[1], [0], [0], [1], [0, 0, 1, 1], [], []>} : vector<8x32xf32>, vector<32x128xf32>, vector<8x128xf32> -> vector<8x128xf32>
    %196 = arith.addf %194, %195 : vector<8x128xf32>
    %197 = arith.negf %196 : vector<8x128xf32>
    %198 = math.exp %197 : vector<8x128xf32>
    %cst_53 = arith.constant 1.000000e+00 : f32
    %199 = vector.broadcast %cst_53 : f32 to vector<8x128xf32>
    %200 = arith.addf %199, %198 : vector<8x128xf32>
    %201 = arith.divf %199, %200 : vector<8x128xf32>
    %202 = math.tanh %196 : vector<8x128xf32>
    %203 = vector.extract_strided_slice %201 {offsets = [0, 0], sizes = [8, 32], strides = [1, 1]} : vector<8x128xf32> to vector<8x32xf32>
    %204 = vector.extract_strided_slice %201 {offsets = [0, 32], sizes = [8, 32], strides = [1, 1]} : vector<8x128xf32> to vector<8x32xf32>
    %205 = vector.extract_strided_slice %202 {offsets = [0, 64], sizes = [8, 32], strides = [1, 1]} : vector<8x128xf32> to vector<8x32xf32>
    %206 = vector.extract_strided_slice %201 {offsets = [0, 96], sizes = [8, 32], strides = [1, 1]} : vector<8x128xf32> to vector<8x32xf32>
    %207 = arith.mulf %204, %160 : vector<8x32xf32>
    %208 = arith.mulf %203, %205 : vector<8x32xf32>
    %209 = arith.addf %207, %208 : vector<8x32xf32>
    %210 = math.tanh %209 : vector<8x32xf32>
    %211 = arith.mulf %206, %210 : vector<8x32xf32>
    %212 = vector.shape_cast %192 : vector<8x1xi1> to vector<8x1xi1>
    %213 = vector.broadcast %212 : vector<8x1xi1> to vector<8x32xi1>
    %214 = arith.select %213, %211, %157 : vector<8x32xi1>, vector<8x32xf32>
    %215 = vector.shape_cast %192 : vector<8x1xi1> to vector<8x1xi1>
    %216 = vector.broadcast %215 : vector<8x1xi1> to vector<8x32xi1>
    %217 = arith.select %216, %209, %160 : vector<8x32xi1>, vector<8x32xf32>
    %cst_54 = arith.constant dense<0.000000e+00> : vector<8x128xf32>
    %218 = tpu.matmul %211, %11, %cst_54 {dimension_numbers = #tpu.dot_dimension_numbers<[1], [0], [0], [1], [0, 0, 1, 1], [], []>} : vector<8x32xf32>, vector<32x128xf32>, vector<8x128xf32> -> vector<8x128xf32>
    %cst_55 = arith.constant dense<0.000000e+00> : vector<8x128xf32>
    %219 = tpu.matmul %183, %13, %cst_55 {dimension_numbers = #tpu.dot_dimension_numbers<[1], [0], [0], [1], [0, 0, 1, 1], [], []>} : vector<8x32xf32>, vector<32x128xf32>, vector<8x128xf32> -> vector<8x128xf32>
    %220 = arith.addf %218, %219 : vector<8x128xf32>
    %221 = vector.broadcast %15 : vector<1x128xf32> to vector<8x128xf32>
    %222 = arith.addf %220, %221 : vector<8x128xf32>
    %223 = arith.negf %222 : vector<8x128xf32>
    %224 = math.exp %223 : vector<8x128xf32>
    %cst_56 = arith.constant 1.000000e+00 : f32
    %225 = vector.broadcast %cst_56 : f32 to vector<8x128xf32>
    %226 = arith.addf %225, %224 : vector<8x128xf32>
    %227 = arith.divf %225, %226 : vector<8x128xf32>
    %228 = math.tanh %222 : vector<8x128xf32>
    %229 = vector.extract_strided_slice %227 {offsets = [0, 0], sizes = [8, 32], strides = [1, 1]} : vector<8x128xf32> to vector<8x32xf32>
    %230 = vector.extract_strided_slice %227 {offsets = [0, 32], sizes = [8, 32], strides = [1, 1]} : vector<8x128xf32> to vector<8x32xf32>
    %231 = vector.extract_strided_slice %228 {offsets = [0, 64], sizes = [8, 32], strides = [1, 1]} : vector<8x128xf32> to vector<8x32xf32>
    %232 = vector.extract_strided_slice %227 {offsets = [0, 96], sizes = [8, 32], strides = [1, 1]} : vector<8x128xf32> to vector<8x32xf32>
    %233 = arith.mulf %230, %186 : vector<8x32xf32>
    %234 = arith.mulf %229, %231 : vector<8x32xf32>
    %235 = arith.addf %233, %234 : vector<8x32xf32>
    %236 = math.tanh %235 : vector<8x32xf32>
    %237 = arith.mulf %232, %236 : vector<8x32xf32>
    %238 = vector.shape_cast %192 : vector<8x1xi1> to vector<8x1xi1>
    %239 = vector.broadcast %238 : vector<8x1xi1> to vector<8x32xi1>
    %240 = arith.select %239, %237, %183 : vector<8x32xi1>, vector<8x32xf32>
    %241 = vector.shape_cast %192 : vector<8x1xi1> to vector<8x1xi1>
    %242 = vector.broadcast %241 : vector<8x1xi1> to vector<8x32xi1>
    %243 = arith.select %242, %235, %186 : vector<8x32xi1>, vector<8x32xf32>
    %cst_57 = arith.constant 0.000000e+00 : f32
    %244 = vector.shape_cast %192 : vector<8x1xi1> to vector<8x1xi1>
    %245 = vector.broadcast %244 : vector<8x1xi1> to vector<8x32xi1>
    %246 = vector.broadcast %cst_57 : f32 to vector<8x32xf32>
    %247 = arith.select %245, %237, %246 : vector<8x32xi1>, vector<8x32xf32>
    %c4_i32 = arith.constant 4 : i32
    %248 = vector.broadcast %c4_i32 : i32 to vector<8x1xi32>
    %249 = arith.cmpi sgt, %8, %248 : vector<8x1xi32>
    %c4 = arith.constant 4 : index
    %c0_58 = arith.constant 0 : index
    %c0_59 = arith.constant 0 : index
    %250 = vector.load %arg11[%c4, %c0_58, %c0_59] : memref<8x8x128xf32, #tpu.memory_space<vmem>>, vector<1x8x128xf32>
    %251 = vector.shape_cast %250 : vector<1x8x128xf32> to vector<8x128xf32>
    %cst_60 = arith.constant dense<0.000000e+00> : vector<8x128xf32>
    %252 = tpu.matmul %214, %9, %cst_60 {dimension_numbers = #tpu.dot_dimension_numbers<[1], [0], [0], [1], [0, 0, 1, 1], [], []>} : vector<8x32xf32>, vector<32x128xf32>, vector<8x128xf32> -> vector<8x128xf32>
    %253 = arith.addf %251, %252 : vector<8x128xf32>
    %254 = arith.negf %253 : vector<8x128xf32>
    %255 = math.exp %254 : vector<8x128xf32>
    %cst_61 = arith.constant 1.000000e+00 : f32
    %256 = vector.broadcast %cst_61 : f32 to vector<8x128xf32>
    %257 = arith.addf %256, %255 : vector<8x128xf32>
    %258 = arith.divf %256, %257 : vector<8x128xf32>
    %259 = math.tanh %253 : vector<8x128xf32>
    %260 = vector.extract_strided_slice %258 {offsets = [0, 0], sizes = [8, 32], strides = [1, 1]} : vector<8x128xf32> to vector<8x32xf32>
    %261 = vector.extract_strided_slice %258 {offsets = [0, 32], sizes = [8, 32], strides = [1, 1]} : vector<8x128xf32> to vector<8x32xf32>
    %262 = vector.extract_strided_slice %259 {offsets = [0, 64], sizes = [8, 32], strides = [1, 1]} : vector<8x128xf32> to vector<8x32xf32>
    %263 = vector.extract_strided_slice %258 {offsets = [0, 96], sizes = [8, 32], strides = [1, 1]} : vector<8x128xf32> to vector<8x32xf32>
    %264 = arith.mulf %261, %217 : vector<8x32xf32>
    %265 = arith.mulf %260, %262 : vector<8x32xf32>
    %266 = arith.addf %264, %265 : vector<8x32xf32>
    %267 = math.tanh %266 : vector<8x32xf32>
    %268 = arith.mulf %263, %267 : vector<8x32xf32>
    %269 = vector.shape_cast %249 : vector<8x1xi1> to vector<8x1xi1>
    %270 = vector.broadcast %269 : vector<8x1xi1> to vector<8x32xi1>
    %271 = arith.select %270, %268, %214 : vector<8x32xi1>, vector<8x32xf32>
    %272 = vector.shape_cast %249 : vector<8x1xi1> to vector<8x1xi1>
    %273 = vector.broadcast %272 : vector<8x1xi1> to vector<8x32xi1>
    %274 = arith.select %273, %266, %217 : vector<8x32xi1>, vector<8x32xf32>
    %cst_62 = arith.constant dense<0.000000e+00> : vector<8x128xf32>
    %275 = tpu.matmul %268, %11, %cst_62 {dimension_numbers = #tpu.dot_dimension_numbers<[1], [0], [0], [1], [0, 0, 1, 1], [], []>} : vector<8x32xf32>, vector<32x128xf32>, vector<8x128xf32> -> vector<8x128xf32>
    %cst_63 = arith.constant dense<0.000000e+00> : vector<8x128xf32>
    %276 = tpu.matmul %240, %13, %cst_63 {dimension_numbers = #tpu.dot_dimension_numbers<[1], [0], [0], [1], [0, 0, 1, 1], [], []>} : vector<8x32xf32>, vector<32x128xf32>, vector<8x128xf32> -> vector<8x128xf32>
    %277 = arith.addf %275, %276 : vector<8x128xf32>
    %278 = vector.broadcast %15 : vector<1x128xf32> to vector<8x128xf32>
    %279 = arith.addf %277, %278 : vector<8x128xf32>
    %280 = arith.negf %279 : vector<8x128xf32>
    %281 = math.exp %280 : vector<8x128xf32>
    %cst_64 = arith.constant 1.000000e+00 : f32
    %282 = vector.broadcast %cst_64 : f32 to vector<8x128xf32>
    %283 = arith.addf %282, %281 : vector<8x128xf32>
    %284 = arith.divf %282, %283 : vector<8x128xf32>
    %285 = math.tanh %279 : vector<8x128xf32>
    %286 = vector.extract_strided_slice %284 {offsets = [0, 0], sizes = [8, 32], strides = [1, 1]} : vector<8x128xf32> to vector<8x32xf32>
    %287 = vector.extract_strided_slice %284 {offsets = [0, 32], sizes = [8, 32], strides = [1, 1]} : vector<8x128xf32> to vector<8x32xf32>
    %288 = vector.extract_strided_slice %285 {offsets = [0, 64], sizes = [8, 32], strides = [1, 1]} : vector<8x128xf32> to vector<8x32xf32>
    %289 = vector.extract_strided_slice %284 {offsets = [0, 96], sizes = [8, 32], strides = [1, 1]} : vector<8x128xf32> to vector<8x32xf32>
    %290 = arith.mulf %287, %243 : vector<8x32xf32>
    %291 = arith.mulf %286, %288 : vector<8x32xf32>
    %292 = arith.addf %290, %291 : vector<8x32xf32>
    %293 = math.tanh %292 : vector<8x32xf32>
    %294 = arith.mulf %289, %293 : vector<8x32xf32>
    %295 = vector.shape_cast %249 : vector<8x1xi1> to vector<8x1xi1>
    %296 = vector.broadcast %295 : vector<8x1xi1> to vector<8x32xi1>
    %297 = arith.select %296, %294, %240 : vector<8x32xi1>, vector<8x32xf32>
    %298 = vector.shape_cast %249 : vector<8x1xi1> to vector<8x1xi1>
    %299 = vector.broadcast %298 : vector<8x1xi1> to vector<8x32xi1>
    %300 = arith.select %299, %292, %243 : vector<8x32xi1>, vector<8x32xf32>
    %cst_65 = arith.constant 0.000000e+00 : f32
    %301 = vector.shape_cast %249 : vector<8x1xi1> to vector<8x1xi1>
    %302 = vector.broadcast %301 : vector<8x1xi1> to vector<8x32xi1>
    %303 = vector.broadcast %cst_65 : f32 to vector<8x32xf32>
    %304 = arith.select %302, %294, %303 : vector<8x32xi1>, vector<8x32xf32>
    %c5_i32 = arith.constant 5 : i32
    %305 = vector.broadcast %c5_i32 : i32 to vector<8x1xi32>
    %306 = arith.cmpi sgt, %8, %305 : vector<8x1xi32>
    %c5 = arith.constant 5 : index
    %c0_66 = arith.constant 0 : index
    %c0_67 = arith.constant 0 : index
    %307 = vector.load %arg11[%c5, %c0_66, %c0_67] : memref<8x8x128xf32, #tpu.memory_space<vmem>>, vector<1x8x128xf32>
    %308 = vector.shape_cast %307 : vector<1x8x128xf32> to vector<8x128xf32>
    %cst_68 = arith.constant dense<0.000000e+00> : vector<8x128xf32>
    %309 = tpu.matmul %271, %9, %cst_68 {dimension_numbers = #tpu.dot_dimension_numbers<[1], [0], [0], [1], [0, 0, 1, 1], [], []>} : vector<8x32xf32>, vector<32x128xf32>, vector<8x128xf32> -> vector<8x128xf32>
    %310 = arith.addf %308, %309 : vector<8x128xf32>
    %311 = arith.negf %310 : vector<8x128xf32>
    %312 = math.exp %311 : vector<8x128xf32>
    %cst_69 = arith.constant 1.000000e+00 : f32
    %313 = vector.broadcast %cst_69 : f32 to vector<8x128xf32>
    %314 = arith.addf %313, %312 : vector<8x128xf32>
    %315 = arith.divf %313, %314 : vector<8x128xf32>
    %316 = math.tanh %310 : vector<8x128xf32>
    %317 = vector.extract_strided_slice %315 {offsets = [0, 0], sizes = [8, 32], strides = [1, 1]} : vector<8x128xf32> to vector<8x32xf32>
    %318 = vector.extract_strided_slice %315 {offsets = [0, 32], sizes = [8, 32], strides = [1, 1]} : vector<8x128xf32> to vector<8x32xf32>
    %319 = vector.extract_strided_slice %316 {offsets = [0, 64], sizes = [8, 32], strides = [1, 1]} : vector<8x128xf32> to vector<8x32xf32>
    %320 = vector.extract_strided_slice %315 {offsets = [0, 96], sizes = [8, 32], strides = [1, 1]} : vector<8x128xf32> to vector<8x32xf32>
    %321 = arith.mulf %318, %274 : vector<8x32xf32>
    %322 = arith.mulf %317, %319 : vector<8x32xf32>
    %323 = arith.addf %321, %322 : vector<8x32xf32>
    %324 = math.tanh %323 : vector<8x32xf32>
    %325 = arith.mulf %320, %324 : vector<8x32xf32>
    %326 = vector.shape_cast %306 : vector<8x1xi1> to vector<8x1xi1>
    %327 = vector.broadcast %326 : vector<8x1xi1> to vector<8x32xi1>
    %328 = arith.select %327, %325, %271 : vector<8x32xi1>, vector<8x32xf32>
    %329 = vector.shape_cast %306 : vector<8x1xi1> to vector<8x1xi1>
    %330 = vector.broadcast %329 : vector<8x1xi1> to vector<8x32xi1>
    %331 = arith.select %330, %323, %274 : vector<8x32xi1>, vector<8x32xf32>
    %cst_70 = arith.constant dense<0.000000e+00> : vector<8x128xf32>
    %332 = tpu.matmul %325, %11, %cst_70 {dimension_numbers = #tpu.dot_dimension_numbers<[1], [0], [0], [1], [0, 0, 1, 1], [], []>} : vector<8x32xf32>, vector<32x128xf32>, vector<8x128xf32> -> vector<8x128xf32>
    %cst_71 = arith.constant dense<0.000000e+00> : vector<8x128xf32>
    %333 = tpu.matmul %297, %13, %cst_71 {dimension_numbers = #tpu.dot_dimension_numbers<[1], [0], [0], [1], [0, 0, 1, 1], [], []>} : vector<8x32xf32>, vector<32x128xf32>, vector<8x128xf32> -> vector<8x128xf32>
    %334 = arith.addf %332, %333 : vector<8x128xf32>
    %335 = vector.broadcast %15 : vector<1x128xf32> to vector<8x128xf32>
    %336 = arith.addf %334, %335 : vector<8x128xf32>
    %337 = arith.negf %336 : vector<8x128xf32>
    %338 = math.exp %337 : vector<8x128xf32>
    %cst_72 = arith.constant 1.000000e+00 : f32
    %339 = vector.broadcast %cst_72 : f32 to vector<8x128xf32>
    %340 = arith.addf %339, %338 : vector<8x128xf32>
    %341 = arith.divf %339, %340 : vector<8x128xf32>
    %342 = math.tanh %336 : vector<8x128xf32>
    %343 = vector.extract_strided_slice %341 {offsets = [0, 0], sizes = [8, 32], strides = [1, 1]} : vector<8x128xf32> to vector<8x32xf32>
    %344 = vector.extract_strided_slice %341 {offsets = [0, 32], sizes = [8, 32], strides = [1, 1]} : vector<8x128xf32> to vector<8x32xf32>
    %345 = vector.extract_strided_slice %342 {offsets = [0, 64], sizes = [8, 32], strides = [1, 1]} : vector<8x128xf32> to vector<8x32xf32>
    %346 = vector.extract_strided_slice %341 {offsets = [0, 96], sizes = [8, 32], strides = [1, 1]} : vector<8x128xf32> to vector<8x32xf32>
    %347 = arith.mulf %344, %300 : vector<8x32xf32>
    %348 = arith.mulf %343, %345 : vector<8x32xf32>
    %349 = arith.addf %347, %348 : vector<8x32xf32>
    %350 = math.tanh %349 : vector<8x32xf32>
    %351 = arith.mulf %346, %350 : vector<8x32xf32>
    %352 = vector.shape_cast %306 : vector<8x1xi1> to vector<8x1xi1>
    %353 = vector.broadcast %352 : vector<8x1xi1> to vector<8x32xi1>
    %354 = arith.select %353, %351, %297 : vector<8x32xi1>, vector<8x32xf32>
    %355 = vector.shape_cast %306 : vector<8x1xi1> to vector<8x1xi1>
    %356 = vector.broadcast %355 : vector<8x1xi1> to vector<8x32xi1>
    %357 = arith.select %356, %349, %300 : vector<8x32xi1>, vector<8x32xf32>
    %cst_73 = arith.constant 0.000000e+00 : f32
    %358 = vector.shape_cast %306 : vector<8x1xi1> to vector<8x1xi1>
    %359 = vector.broadcast %358 : vector<8x1xi1> to vector<8x32xi1>
    %360 = vector.broadcast %cst_73 : f32 to vector<8x32xf32>
    %361 = arith.select %359, %351, %360 : vector<8x32xi1>, vector<8x32xf32>
    %c6_i32 = arith.constant 6 : i32
    %362 = vector.broadcast %c6_i32 : i32 to vector<8x1xi32>
    %363 = arith.cmpi sgt, %8, %362 : vector<8x1xi32>
    %c6 = arith.constant 6 : index
    %c0_74 = arith.constant 0 : index
    %c0_75 = arith.constant 0 : index
    %364 = vector.load %arg11[%c6, %c0_74, %c0_75] : memref<8x8x128xf32, #tpu.memory_space<vmem>>, vector<1x8x128xf32>
    %365 = vector.shape_cast %364 : vector<1x8x128xf32> to vector<8x128xf32>
    %cst_76 = arith.constant dense<0.000000e+00> : vector<8x128xf32>
    %366 = tpu.matmul %328, %9, %cst_76 {dimension_numbers = #tpu.dot_dimension_numbers<[1], [0], [0], [1], [0, 0, 1, 1], [], []>} : vector<8x32xf32>, vector<32x128xf32>, vector<8x128xf32> -> vector<8x128xf32>
    %367 = arith.addf %365, %366 : vector<8x128xf32>
    %368 = arith.negf %367 : vector<8x128xf32>
    %369 = math.exp %368 : vector<8x128xf32>
    %cst_77 = arith.constant 1.000000e+00 : f32
    %370 = vector.broadcast %cst_77 : f32 to vector<8x128xf32>
    %371 = arith.addf %370, %369 : vector<8x128xf32>
    %372 = arith.divf %370, %371 : vector<8x128xf32>
    %373 = math.tanh %367 : vector<8x128xf32>
    %374 = vector.extract_strided_slice %372 {offsets = [0, 0], sizes = [8, 32], strides = [1, 1]} : vector<8x128xf32> to vector<8x32xf32>
    %375 = vector.extract_strided_slice %372 {offsets = [0, 32], sizes = [8, 32], strides = [1, 1]} : vector<8x128xf32> to vector<8x32xf32>
    %376 = vector.extract_strided_slice %373 {offsets = [0, 64], sizes = [8, 32], strides = [1, 1]} : vector<8x128xf32> to vector<8x32xf32>
    %377 = vector.extract_strided_slice %372 {offsets = [0, 96], sizes = [8, 32], strides = [1, 1]} : vector<8x128xf32> to vector<8x32xf32>
    %378 = arith.mulf %375, %331 : vector<8x32xf32>
    %379 = arith.mulf %374, %376 : vector<8x32xf32>
    %380 = arith.addf %378, %379 : vector<8x32xf32>
    %381 = math.tanh %380 : vector<8x32xf32>
    %382 = arith.mulf %377, %381 : vector<8x32xf32>
    %383 = vector.shape_cast %363 : vector<8x1xi1> to vector<8x1xi1>
    %384 = vector.broadcast %383 : vector<8x1xi1> to vector<8x32xi1>
    %385 = arith.select %384, %382, %328 : vector<8x32xi1>, vector<8x32xf32>
    %386 = vector.shape_cast %363 : vector<8x1xi1> to vector<8x1xi1>
    %387 = vector.broadcast %386 : vector<8x1xi1> to vector<8x32xi1>
    %388 = arith.select %387, %380, %331 : vector<8x32xi1>, vector<8x32xf32>
    %cst_78 = arith.constant dense<0.000000e+00> : vector<8x128xf32>
    %389 = tpu.matmul %382, %11, %cst_78 {dimension_numbers = #tpu.dot_dimension_numbers<[1], [0], [0], [1], [0, 0, 1, 1], [], []>} : vector<8x32xf32>, vector<32x128xf32>, vector<8x128xf32> -> vector<8x128xf32>
    %cst_79 = arith.constant dense<0.000000e+00> : vector<8x128xf32>
    %390 = tpu.matmul %354, %13, %cst_79 {dimension_numbers = #tpu.dot_dimension_numbers<[1], [0], [0], [1], [0, 0, 1, 1], [], []>} : vector<8x32xf32>, vector<32x128xf32>, vector<8x128xf32> -> vector<8x128xf32>
    %391 = arith.addf %389, %390 : vector<8x128xf32>
    %392 = vector.broadcast %15 : vector<1x128xf32> to vector<8x128xf32>
    %393 = arith.addf %391, %392 : vector<8x128xf32>
    %394 = arith.negf %393 : vector<8x128xf32>
    %395 = math.exp %394 : vector<8x128xf32>
    %cst_80 = arith.constant 1.000000e+00 : f32
    %396 = vector.broadcast %cst_80 : f32 to vector<8x128xf32>
    %397 = arith.addf %396, %395 : vector<8x128xf32>
    %398 = arith.divf %396, %397 : vector<8x128xf32>
    %399 = math.tanh %393 : vector<8x128xf32>
    %400 = vector.extract_strided_slice %398 {offsets = [0, 0], sizes = [8, 32], strides = [1, 1]} : vector<8x128xf32> to vector<8x32xf32>
    %401 = vector.extract_strided_slice %398 {offsets = [0, 32], sizes = [8, 32], strides = [1, 1]} : vector<8x128xf32> to vector<8x32xf32>
    %402 = vector.extract_strided_slice %399 {offsets = [0, 64], sizes = [8, 32], strides = [1, 1]} : vector<8x128xf32> to vector<8x32xf32>
    %403 = vector.extract_strided_slice %398 {offsets = [0, 96], sizes = [8, 32], strides = [1, 1]} : vector<8x128xf32> to vector<8x32xf32>
    %404 = arith.mulf %401, %357 : vector<8x32xf32>
    %405 = arith.mulf %400, %402 : vector<8x32xf32>
    %406 = arith.addf %404, %405 : vector<8x32xf32>
    %407 = math.tanh %406 : vector<8x32xf32>
    %408 = arith.mulf %403, %407 : vector<8x32xf32>
    %409 = vector.shape_cast %363 : vector<8x1xi1> to vector<8x1xi1>
    %410 = vector.broadcast %409 : vector<8x1xi1> to vector<8x32xi1>
    %411 = arith.select %410, %408, %354 : vector<8x32xi1>, vector<8x32xf32>
    %412 = vector.shape_cast %363 : vector<8x1xi1> to vector<8x1xi1>
    %413 = vector.broadcast %412 : vector<8x1xi1> to vector<8x32xi1>
    %414 = arith.select %413, %406, %357 : vector<8x32xi1>, vector<8x32xf32>
    %cst_81 = arith.constant 0.000000e+00 : f32
    %415 = vector.shape_cast %363 : vector<8x1xi1> to vector<8x1xi1>
    %416 = vector.broadcast %415 : vector<8x1xi1> to vector<8x32xi1>
    %417 = vector.broadcast %cst_81 : f32 to vector<8x32xf32>
    %418 = arith.select %416, %408, %417 : vector<8x32xi1>, vector<8x32xf32>
    %c7_i32 = arith.constant 7 : i32
    %419 = vector.broadcast %c7_i32 : i32 to vector<8x1xi32>
    %420 = arith.cmpi sgt, %8, %419 : vector<8x1xi32>
    %c7 = arith.constant 7 : index
    %c0_82 = arith.constant 0 : index
    %c0_83 = arith.constant 0 : index
    %421 = vector.load %arg11[%c7, %c0_82, %c0_83] : memref<8x8x128xf32, #tpu.memory_space<vmem>>, vector<1x8x128xf32>
    %422 = vector.shape_cast %421 : vector<1x8x128xf32> to vector<8x128xf32>
    %cst_84 = arith.constant dense<0.000000e+00> : vector<8x128xf32>
    %423 = tpu.matmul %385, %9, %cst_84 {dimension_numbers = #tpu.dot_dimension_numbers<[1], [0], [0], [1], [0, 0, 1, 1], [], []>} : vector<8x32xf32>, vector<32x128xf32>, vector<8x128xf32> -> vector<8x128xf32>
    %424 = arith.addf %422, %423 : vector<8x128xf32>
    %425 = arith.negf %424 : vector<8x128xf32>
    %426 = math.exp %425 : vector<8x128xf32>
    %cst_85 = arith.constant 1.000000e+00 : f32
    %427 = vector.broadcast %cst_85 : f32 to vector<8x128xf32>
    %428 = arith.addf %427, %426 : vector<8x128xf32>
    %429 = arith.divf %427, %428 : vector<8x128xf32>
    %430 = math.tanh %424 : vector<8x128xf32>
    %431 = vector.extract_strided_slice %429 {offsets = [0, 0], sizes = [8, 32], strides = [1, 1]} : vector<8x128xf32> to vector<8x32xf32>
    %432 = vector.extract_strided_slice %429 {offsets = [0, 32], sizes = [8, 32], strides = [1, 1]} : vector<8x128xf32> to vector<8x32xf32>
    %433 = vector.extract_strided_slice %430 {offsets = [0, 64], sizes = [8, 32], strides = [1, 1]} : vector<8x128xf32> to vector<8x32xf32>
    %434 = vector.extract_strided_slice %429 {offsets = [0, 96], sizes = [8, 32], strides = [1, 1]} : vector<8x128xf32> to vector<8x32xf32>
    %435 = arith.mulf %432, %388 : vector<8x32xf32>
    %436 = arith.mulf %431, %433 : vector<8x32xf32>
    %437 = arith.addf %435, %436 : vector<8x32xf32>
    %438 = math.tanh %437 : vector<8x32xf32>
    %439 = arith.mulf %434, %438 : vector<8x32xf32>
    %440 = vector.shape_cast %420 : vector<8x1xi1> to vector<8x1xi1>
    %441 = vector.broadcast %440 : vector<8x1xi1> to vector<8x32xi1>
    %442 = arith.select %441, %439, %385 : vector<8x32xi1>, vector<8x32xf32>
    %443 = vector.shape_cast %420 : vector<8x1xi1> to vector<8x1xi1>
    %444 = vector.broadcast %443 : vector<8x1xi1> to vector<8x32xi1>
    %445 = arith.select %444, %437, %388 : vector<8x32xi1>, vector<8x32xf32>
    %cst_86 = arith.constant dense<0.000000e+00> : vector<8x128xf32>
    %446 = tpu.matmul %439, %11, %cst_86 {dimension_numbers = #tpu.dot_dimension_numbers<[1], [0], [0], [1], [0, 0, 1, 1], [], []>} : vector<8x32xf32>, vector<32x128xf32>, vector<8x128xf32> -> vector<8x128xf32>
    %cst_87 = arith.constant dense<0.000000e+00> : vector<8x128xf32>
    %447 = tpu.matmul %411, %13, %cst_87 {dimension_numbers = #tpu.dot_dimension_numbers<[1], [0], [0], [1], [0, 0, 1, 1], [], []>} : vector<8x32xf32>, vector<32x128xf32>, vector<8x128xf32> -> vector<8x128xf32>
    %448 = arith.addf %446, %447 : vector<8x128xf32>
    %449 = vector.broadcast %15 : vector<1x128xf32> to vector<8x128xf32>
    %450 = arith.addf %448, %449 : vector<8x128xf32>
    %451 = arith.negf %450 : vector<8x128xf32>
    %452 = math.exp %451 : vector<8x128xf32>
    %cst_88 = arith.constant 1.000000e+00 : f32
    %453 = vector.broadcast %cst_88 : f32 to vector<8x128xf32>
    %454 = arith.addf %453, %452 : vector<8x128xf32>
    %455 = arith.divf %453, %454 : vector<8x128xf32>
    %456 = math.tanh %450 : vector<8x128xf32>
    %457 = vector.extract_strided_slice %455 {offsets = [0, 0], sizes = [8, 32], strides = [1, 1]} : vector<8x128xf32> to vector<8x32xf32>
    %458 = vector.extract_strided_slice %455 {offsets = [0, 32], sizes = [8, 32], strides = [1, 1]} : vector<8x128xf32> to vector<8x32xf32>
    %459 = vector.extract_strided_slice %456 {offsets = [0, 64], sizes = [8, 32], strides = [1, 1]} : vector<8x128xf32> to vector<8x32xf32>
    %460 = vector.extract_strided_slice %455 {offsets = [0, 96], sizes = [8, 32], strides = [1, 1]} : vector<8x128xf32> to vector<8x32xf32>
    %461 = arith.mulf %458, %414 : vector<8x32xf32>
    %462 = arith.mulf %457, %459 : vector<8x32xf32>
    %463 = arith.addf %461, %462 : vector<8x32xf32>
    %464 = math.tanh %463 : vector<8x32xf32>
    %465 = arith.mulf %460, %464 : vector<8x32xf32>
    %466 = vector.shape_cast %420 : vector<8x1xi1> to vector<8x1xi1>
    %467 = vector.broadcast %466 : vector<8x1xi1> to vector<8x32xi1>
    %468 = arith.select %467, %465, %411 : vector<8x32xi1>, vector<8x32xf32>
    %469 = vector.shape_cast %420 : vector<8x1xi1> to vector<8x1xi1>
    %470 = vector.broadcast %469 : vector<8x1xi1> to vector<8x32xi1>
    %471 = arith.select %470, %463, %414 : vector<8x32xi1>, vector<8x32xf32>
    %cst_89 = arith.constant 0.000000e+00 : f32
    %472 = vector.shape_cast %420 : vector<8x1xi1> to vector<8x1xi1>
    %473 = vector.broadcast %472 : vector<8x1xi1> to vector<8x32xi1>
    %474 = vector.broadcast %cst_89 : f32 to vector<8x32xf32>
    %475 = arith.select %473, %465, %474 : vector<8x32xi1>, vector<8x32xf32>
    %476 = vector.shape_cast %76 : vector<8x32xf32> to vector<1x8x32xf32>
    %477 = vector.shape_cast %133 : vector<8x32xf32> to vector<1x8x32xf32>
    %478 = vector.shape_cast %190 : vector<8x32xf32> to vector<1x8x32xf32>
    %479 = vector.shape_cast %247 : vector<8x32xf32> to vector<1x8x32xf32>
    %480 = vector.shape_cast %304 : vector<8x32xf32> to vector<1x8x32xf32>
    %481 = vector.shape_cast %361 : vector<8x32xf32> to vector<1x8x32xf32>
    %482 = vector.shape_cast %418 : vector<8x32xf32> to vector<1x8x32xf32>
    %483 = vector.shape_cast %475 : vector<8x32xf32> to vector<1x8x32xf32>
    %484 = tpu.concatenate %476, %477, %478, %479, %480, %481, %482, %483 in 0 : vector<1x8x32xf32>, vector<1x8x32xf32>, vector<1x8x32xf32>, vector<1x8x32xf32>, vector<1x8x32xf32>, vector<1x8x32xf32>, vector<1x8x32xf32>, vector<1x8x32xf32> -> vector<8x8x32xf32>
    %c0_90 = arith.constant 0 : index
    %c0_91 = arith.constant 0 : index
    %c0_92 = arith.constant 0 : index
    %485 = vector.load %arg8[%c0_90, %c0_91, %c0_92] : memref<8x8x32xf32, #tpu.memory_space<vmem>>, vector<8x8x32xf32>
    tpu.vector_store %arg8[%c0_90, %c0_91, %c0_92], %484 {strides = array<i32>} : memref<8x8x32xf32, #tpu.memory_space<vmem>>, vector<8x8x32xf32>,
    %486 = vector.shape_cast %442 : vector<8x32xf32> to vector<1x8x32xf32>
    %487 = vector.shape_cast %468 : vector<8x32xf32> to vector<1x8x32xf32>
    %488 = tpu.concatenate %486, %487 in 0 : vector<1x8x32xf32>, vector<1x8x32xf32> -> vector<2x8x32xf32>
    %c0_93 = arith.constant 0 : index
    %c0_94 = arith.constant 0 : index
    %c0_95 = arith.constant 0 : index
    %489 = vector.load %arg9[%c0_93, %c0_94, %c0_95] : memref<2x8x32xf32, #tpu.memory_space<vmem>>, vector<2x8x32xf32>
    tpu.vector_store %arg9[%c0_93, %c0_94, %c0_95], %488 {strides = array<i32>} : memref<2x8x32xf32, #tpu.memory_space<vmem>>, vector<2x8x32xf32>,
    %490 = vector.shape_cast %445 : vector<8x32xf32> to vector<1x8x32xf32>
    %491 = vector.shape_cast %471 : vector<8x32xf32> to vector<1x8x32xf32>
    %492 = tpu.concatenate %490, %491 in 0 : vector<1x8x32xf32>, vector<1x8x32xf32> -> vector<2x8x32xf32>
    %c0_96 = arith.constant 0 : index
    %c0_97 = arith.constant 0 : index
    %c0_98 = arith.constant 0 : index
    %493 = vector.load %arg10[%c0_96, %c0_97, %c0_98] : memref<2x8x32xf32, #tpu.memory_space<vmem>>, vector<2x8x32xf32>
    tpu.vector_store %arg10[%c0_96, %c0_97, %c0_98], %492 {strides = array<i32>} : memref<2x8x32xf32, #tpu.memory_space<vmem>>, vector<2x8x32xf32>,
    return
  }
}

</mosaic_0001>

<bundles_post_ra>
// kernel: rnn_encoder_forward.1
= control target key start
LH: loop header
LB: loop body
LE: loop exit
PB: predicated region body
PF: predicated region fallthrough
CT: control target
= control target key end

     0   :  { %v3188_v2 = vmov 0.0   ;;  %vm3189_vm0 = vmmov 0   ;;  %vm51_vm1 = vcmask 261120   ;;  %v3190_v11 = vmov 0   ;;  %s3191_s16 = smov 64   ;;  %s3192_s17 = smov 32   ;;  %s4159_s2 = inlined_call_operand.vmem [shape: f32[32,128], index: 2, kind: input, shape index: {}]   ;;  %s4160_s3 = inlined_call_operand.vmem [shape: f32[32,128], index: 3, kind: input, shape index: {}]   ;;  %s4161_s1 = inlined_call_operand.vmem [shape: f32[64,32], index: 1, kind: input, shape index: {}]   ;;  %s4162_s0 = inlined_call_operand.vmem [shape: s32[8,1], index: 0, kind: input, shape index: {}]   ;;  %s4163_s4 = inlined_call_operand.vmem [shape: f32[1,128], index: 4, kind: input, shape index: {}]   ;;  %s4164_s5 = inlined_call_operand.vmem [shape: f32[1,32,128], index: 5, kind: input, shape index: {}]   ;;  %s4165_s6 = inlined_call_operand.vmem [shape: f32[1,32,128], index: 6, kind: input, shape index: {}]   ;;  %s4166_s7 = inlined_call_operand.vmem [shape: f32[1,1,128], index: 7, kind: input, shape index: {}]   ;;  %s4167_s8 = inlined_call_operand.vmem [shape: f32[8,8,32], index: 8, kind: output, shape index: {0}]   ;;  %s4168_s9 = inlined_call_operand.vmem [shape: f32[2,8,32], index: 9, kind: output, shape index: {1}]   ;;  %s4169_s10 = inlined_call_operand.vmem [shape: f32[2,8,32], index: 10, kind: output, shape index: {2}]  }
   0x1   :  { %v43_v0 = vld [vmem:[%s4159_s2 + $0x18] sm:$0xff]  ;;  %v42_v1 = vld [vmem:[%s4159_s2 + $0x10] sm:$0xff]  ;;  %2773 = vmatprep.subr.mxu1 %v3188_v2  ;;  %2781 = vmatprep.mubr.msk.f32.mxu1 %vm3189_vm0, %v3188_v2  ;;  %v41_v5 = vld [vmem:[%s4159_s2 + $0x8] sm:$0xff] }
   0x2   :  { %v3259_v3 = vld [vmem:[%s4160_s3 + $0x18] sm:$0xff]  ;;  %2753 = vmatprep.subr.mxu0 %v43_v0  ;;  %v3267_v4 = vld [vmem:[%s4160_s3 + $0x10] sm:$0xff]  ;;  %v32_v6 = vld [vmem:[%s4161_s1] sm:$0xff]  ;;  %3043 = vset.pattern.permute.xlu1 %v3190_v11 }
   0x3   :  { %2774 = vmatpush3.msra.mxu1 %v3259_v3  ;;  %2754 = vmatpush3.msra.mxu0 %v43_v0  ;;  %v3280_v7 = vld [vmem:[%s4160_s3 + $0x8] sm:$0xff]  ;;  %v40_v8 = vld [vmem:[%s4159_s2] sm:$0xff]  ;;  %v34_v31 = vld [vmem:[%s4161_s1 + $0x10] sm:$0xff] }
   0x4   :  { %2775 = vmatprep.subr.mxu1 %v3188_v2  ;;  %2755 = vmatprep.subr.mxu0 %v42_v1  ;;  %v3290_v9 = vld [vmem:[%s4160_s3] sm:$0xff]  ;;  %v33_v10 = vld [vmem:[%s4161_s1 + $0x8] sm:$0xff]  ;;  %v35_v32 = vld [vmem:[%s4161_s1 + $0x18] sm:$0xff] }
   0x5   :  { %2776 = vmatpush3.msra.mxu1 %v3267_v4  ;;  %2756 = vmatpush3.msra.mxu0 %v42_v1  ;;  %v3308_v12 = vld [vmem:[%s4162_s0] sm:$0xff]  ;;  %v3335_v33 = vld [vmem:[%s4164_s5 + $0x18] sm:$0xff]  ;;  %v3346_v35 = vld [vmem:[%s4165_s6 + $0x10] sm:$0xff] }
   0x6   :  { %2777 = vmatprep.subr.mxu1 %v3188_v2  ;;  %2757 = vmatprep.subr.mxu0 %v41_v5  ;;  %vm203_vm2 = vcmp.gt.s32.totalorder %v3308_v12, 0  ;;  %v3318_v16 = vld [vmem:[%s4163_s4] ss:$0 sm:$0xff]  ;;  %v3341_v34 = vld [vmem:[%s4165_s6 + $0x18] sm:$0xff]  ;;  %v3353_v36 = vld [vmem:[%s4164_s5 + $0x10] sm:$0xff]  ;;  %vm488_vm4 = vcmp.gt.s32.totalorder %v3308_v12, 1 }
   0x7   :  { %2761 = vmatprep.mubr.msk.f32.mxu0 %vm51_vm1, %v32_v6  ;;  %2758 = vmatpush3.msra.mxu0 %v41_v5  ;;  %v303_v13 = vsel %vm203_vm2, 1, %v3190_v11  ;;  %v36_v37 = vld [vmem:[%s4161_s1 + $0x20] sm:$0xff]  ;;  %v37_v38 = vld [vmem:[%s4161_s1 + $0x28] sm:$0xff]  ;;  %v38_v42 = vld [vmem:[%s4161_s1 + $0x30] sm:$0xff]  ;;  %vm776_vm6 = vcmp.gt.s32.totalorder %v3308_v12, 2  ;;  %vm1064_vm8 = vcmp.gt.s32.totalorder %v3308_v12, 3 }
   0x8   :  { %2778 = vmatpush3.msra.mxu1 %v3280_v7  ;;  %2759 = vmatprep.subr.mxu0 %v40_v8  ;;  %v3368_v39 = vld [vmem:[%s4165_s6 + $0x8] sm:$0xff]  ;;  %v3382_v41 = vld [vmem:[%s4165_s6] sm:$0xff]  ;;  %v39_v43 = vld [vmem:[%s4161_s1 + $0x38] sm:$0xff]  ;;  %vm1352_vm10 = vcmp.gt.s32.totalorder %v3308_v12, 4 }
   0x9   :  { %2779 = vmatprep.subr.mxu1 %v3188_v2  ;;  %2760 = vmatpush3.msra.mxu0 %v40_v8  ;;  %v3375_v40 = vld [vmem:[%s4164_s5 + $0x8] sm:$0xff]  ;;  %v3401_v45 = vld [vmem:[%s4164_s5] sm:$0xff] }
   0xa   :  { %2780 = vmatpush3.msra.mxu1 %v3290_v9  ;;  %2762 = vmatmul.mubr.msk.f32.vlgmr.msra.gmra.mxu0 %vm51_vm1, %v33_v10  ;;  %v3469_v61 = vld [vmem:[%s4166_s7] ss:$0 sm:$0xff] }
   0xb   :  { %2782 = vmatmul.mubr.f32.vlgmr.msra.gmra.mxu1 %v3188_v2  ;;  %2795 = vmatprep.subr.mxu0 %v3188_v2 }
   0xc   :  { %2784 = vmatprep.subr.mxu1 %v3188_v2  ;;  %2792 = vmatprep.mubr.msk.f32.mxu1 %vm3189_vm0, %v3188_v2 }
   0xd   :  { %3044 = vset.pattern.permute.xlu0 %v3190_v11  ;;  %305 = vperm.xlu1 %3043, %v303_v13  }
   0xe   :  { %2764 = vmatprep.mubr.msk.f32.mxu0 %vm51_vm1, %v34_v31  ;;  %2796 = vmatpush3.msra.mxu0 %v3335_v33 }
   0xf   :  { %2785 = vmatpush3.msra.mxu1 %v3341_v34  ;;  %2765 = vmatmul.mubr.msk.f32.gmra.mxu0 %vm51_vm1, %v35_v32 }
  0x10   :  { %2786 = vmatprep.subr.mxu1 %v3188_v2  ;;  %2797 = vmatprep.subr.mxu0 %v3188_v2 }
  0x11   :  { %2787 = vmatpush3.msra.mxu1 %v3346_v35  ;;  %2798 = vmatpush3.msra.mxu0 %v3353_v36 }
  0x12   :  { %2767 = vmatprep.mubr.msk.f32.mxu0 %vm51_vm1, %v36_v37  ;;  %2788 = vmatprep.subr.mxu1 %v3188_v2 }
  0x13   :  { %2799 = vmatprep.subr.mxu0 %v3188_v2  ;;  %2768 = vmatmul.mubr.msk.f32.gmra.mxu0 %vm51_vm1, %v37_v38 }
  0x14   :  { %2789 = vmatpush3.msra.mxu1 %v3368_v39  ;;  %2800 = vmatpush3.msra.mxu0 %v3375_v40 }
  0x15   :  { %2790 = vmatprep.subr.mxu1 %v3188_v2  ;;  %2770 = vmatprep.mubr.msk.f32.mxu0 %vm51_vm1, %v38_v42 }
  0x16   :  { %2791 = vmatpush3.msra.mxu1 %v3382_v41  ;;  %2801 = vmatprep.subr.mxu0 %v3188_v2 }
  0x17   :  { %2806 = vmatprep.subr.mxu1 %v3188_v2  ;;  %2771 = vmatmul.mubr.msk.f32.gmra.mxu0 %vm51_vm1, %v39_v43 }
  0x18   :  { %2793 = vmatmul.mubr.f32.vlgmr.msra.gmra.mxu1 %v3188_v2  ;;  %2802 = vmatpush3.msra.mxu0 %v3401_v45 }
  0x19   :  { %2807 = vmatpush3.msra.mxu1 %v3259_v3  ;;  %2803 = vmatprep.mubr.msk.f32.mxu0 %vm3189_vm0, %v3188_v2 }
  0x1a   :  { %2808 = vmatprep.subr.mxu1 %v3188_v2  ;;  %2814 = vmatprep.mubr.msk.f32.mxu1 %vm3189_vm0, %v3188_v2 }
  0x1b   :  { %2809 = vmatpush3.msra.mxu1 %v3267_v4  ;;  %2817 = vmatprep.subr.mxu0 %v3188_v2 }
  0x1c   :  { %2810 = vmatprep.subr.mxu1 %v3188_v2 }
  0x1d   :  { %2811 = vmatpush3.msra.mxu1 %v3280_v7 }
  0x1e   :  { %2812 = vmatprep.subr.mxu1 %v3188_v2 }
  0x1f   :  { %2813 = vmatpush3.msra.mxu1 %v3290_v9 }
  0x20   :  { %2828 = vmatprep.subr.mxu1 %v3188_v2 }
  0x88   :  { %v3420_v46 = vpop.permute.xlu1 %305 }
  0x89   :  { %vm307_vm3 = vcmp.eq.s32.totalorder %v3420_v46, 1 }
  0xca   :  { %v3313_v14 = vpop.f32.mrf.mxu0 }
  0xcb   :  { %v274_v15 = vpop.f32.mrf.mxu1  ;;  %v148_v60 = vadd.f32 %v3313_v14, %v3318_v16 }
  0xcc   :  { %v142_v17 = vpop.f32.mrf.mxu0 }
  0xcd   :  { %v2783_v18 = vpop.f32.mrf.mxu1  ;;  %v143_v19 = vadd.f32 %v3318_v16, %v142_v17 }
  0xcf   :  { %v278_v20 = vadd.f32 %v274_v15, %v143_v19  ;;  %v3452_v54 = vpop.f32.mrf.mxu0 }
  0xd1   :  { %3045 = vtanh.f32 %v278_v20  ;;  %v2582_v22 = vmul.f32 -1.442695, %v278_v20  ;;  %v3454_v55 = vpop.f32.mrf.mxu0 }
  0xd3   :  { %3047 = vpow2.f32 %v2582_v22  ;;  %v3456_v56 = vpop.f32.mrf.mxu0 }
  0xd5   :  { %v3458_v57 = vpop.f32.mrf.mxu0 }
  0xd7   :  { %v3460_v58 = vpop.f32.mrf.mxu0 }
  0xd8   :  { %v376_v50 = vpop.f32.mrf.mxu1 }
  0xd9   :  { %v3462_v59 = vpop.f32.mrf.mxu0 }
  0xda   :  { %v2794_v51 = vpop.f32.mrf.mxu1 }
  0xde   :  { %v3046_v21 = vpop.eup %3045 }
  0xdf   :  { %288 = vrot.lane.b32.xlu0 %v3046_v21, %s3191_s16 }
  0xe0   :  { %v3048_v23 = vpop.eup %3047 }
  0xe1   :  { %v282_v24 = vadd.f32 1.0, %v3048_v23 }
  0xe3   :  { %3049 = vrcp.f32 %v282_v24 }
  0xf0   :  { %v3050_v25 = vpop.eup %3049 }
  0xf1   :  { %v286_v28 = vmul.f32 0.0, %v3050_v25 }
 0x151   :  { %v289_v26 = vpop.permute.xlu0 %288 }
 0x152   :  { %v291_v27 = vmul.f32 %v3050_v25, %v289_v26 }
 0x154   :  { %293 = vrot.lane.b32.xlu0 %v291_v27, %s3192_s17 }
 0x1c6   :  { %v294_v29 = vpop.permute.xlu0 %293 }
 0x1c7   :  { %v3323_v30 = vadd.f32 %v294_v29, %v286_v28 }
 0x1c9   :  { %3051 = vtanh.f32 %v3323_v30  ;;  %v3479_v27 = vsel %vm307_vm3, %v3323_v30, 0.0  ;;  %v591_v30 = vsel %vm488_vm4, 1, %v3190_v11 }
 0x1d6   :  { %v3052_v44 = vpop.eup %3051 }
 0x1d7   :  { %299 = vrot.lane.b32.xlu1 %v3052_v44, %s3191_s16 }
 0x249   :  { %v300_v47 = vpop.permute.xlu1 %299 }
 0x24a   :  { %v302_v48 = vmul.f32 %v3050_v25, %v300_v47 }
 0x24c   :  { %381 = vrot.lane.b32.xlu0 %v302_v48, %s3192_s17  ;;  %v3426_v49 = vsel %vm307_vm3, %v302_v48, 0.0 }
 0x24d   :  { %492 = vrot.lane.b32.xlu1 %v3426_v49, %s3192_s17 }
 0x2be   :  { %v382_v52 = vpop.permute.xlu0 %381 }
 0x2bf   :  { %2804 = vmatmul.mubr.msk.f32.vlgmr.msra.gmra.mxu0 %vm51_vm1, %v382_v52  ;;  %v493_v53 = vpop.permute.xlu1 %492 }
 0x2c0   :  { %2815 = vmatmul.mubr.msk.f32.vlgmr.msra.gmra.mxu1 %vm51_vm1, %v493_v53  ;;  %2818 = vmatpush3.msra.mxu0 %v3341_v34 }
 0x2c1   :  { %2819 = vmatprep.subr.mxu0 %v3188_v2  ;;  %2829 = vmatpush3.msra.mxu1 %v3335_v33 }
 0x2c2   :  { %2820 = vmatpush3.msra.mxu0 %v3346_v35  ;;  %2830 = vmatprep.subr.mxu1 %v3188_v2 }
 0x2c3   :  { %2821 = vmatprep.subr.mxu0 %v3188_v2  ;;  %2825 = vmatprep.mubr.msk.f32.mxu0 %vm3189_vm0, %v3188_v2 }
 0x2c4   :  { %2822 = vmatpush3.msra.mxu0 %v3368_v39  ;;  %2831 = vmatpush3.msra.mxu1 %v3353_v36 }
 0x2c5   :  { %2823 = vmatprep.subr.mxu0 %v3188_v2  ;;  %2832 = vmatprep.subr.mxu1 %v3188_v2 }
 0x2c6   :  { %2824 = vmatpush3.msra.mxu0 %v3382_v41  ;;  %2833 = vmatpush3.msra.mxu1 %v3375_v40 }
 0x2c7   :  { %2834 = vmatprep.subr.mxu1 %v3188_v2  ;;  %2836 = vmatprep.mubr.msk.f32.mxu1 %vm3189_vm0, %v3188_v2 }
 0x2c8   :  { %2835 = vmatpush3.msra.mxu1 %v3401_v45  ;;  %2839 = vmatprep.subr.mxu0 %v3188_v2 }
 0x2c9   :  { %2850 = vmatprep.subr.mxu1 %v3188_v2 }
 0x37f   :  { %v451_v62 = vpop.f32.mrf.mxu0 }
 0x380   :  { %v452_v63 = vadd.f32 %v451_v62, %v376_v50  ;;  %v562_v0 = vpop.f32.mrf.mxu1 }
 0x381   :  { %v566_v1 = vadd.f32 %v562_v0, %v148_v60  ;;  %v2805_v5 = vpop.f32.mrf.mxu0 }
 0x382   :  { %v461_v6 = vadd.f32 %v3469_v61, %v452_v63  ;;  %v2816_v8 = vpop.f32.mrf.mxu1 }
 0x383   :  { %3053 = vtanh.f32 %v566_v1  ;;  %v2587_v14 = vmul.f32 -1.442695, %v566_v1 }
 0x384   :  { %3055 = vtanh.f32 %v461_v6  ;;  %v2585_v15 = vmul.f32 -1.442695, %v461_v6 }
 0x385   :  { %3057 = vpow2.f32 %v2587_v14 }
 0x386   :  { %3059 = vpow2.f32 %v2585_v15 }
 0x390   :  { %v3054_v10 = vpop.eup %3053 }
 0x391   :  { %v3056_v13 = vpop.eup %3055  ;;  %576 = vrot.lane.b32.xlu1 %v3054_v10, %s3191_s16  ;;  %v153_v10 = vadd.f32 %v3318_v16, %v3454_v55 }
 0x392   :  { %471 = vrot.lane.b32.xlu0 %v3056_v13, %s3191_s16  ;;  %v3058_v17 = vpop.eup %3057 }
 0x393   :  { %v3060_v18 = vpop.eup %3059  ;;  %v570_v19 = vadd.f32 1.0, %v3058_v17 }
 0x394   :  { %v465_v20 = vadd.f32 1.0, %v3060_v18 }
 0x395   :  { %3061 = vrcp.f32 %v570_v19 }
 0x396   :  { %3063 = vrcp.f32 %v465_v20 }
 0x3a2   :  { %v3062_v21 = vpop.eup %3061 }
 0x3a3   :  { %v3064_v23 = vpop.eup %3063  ;;  %v574_v28 = vmul.f32 %v3062_v21, %v3479_v27 }
 0x3a4   :  { %v469_v31 = vmul.f32 0.0, %v3064_v23 }
 0x403   :  { %v577_v22 = vpop.permute.xlu1 %576 }
 0x404   :  { %v579_v24 = vmul.f32 %v3062_v21, %v577_v22  ;;  %v472_v25 = vpop.permute.xlu0 %471 }
 0x405   :  { %v474_v26 = vmul.f32 %v3064_v23, %v472_v25 }
 0x406   :  { %581 = vrot.lane.b32.xlu1 %v579_v24, %s3192_s17 }
 0x407   :  { %476 = vrot.lane.b32.xlu0 %v474_v26, %s3192_s17 }
 0x478   :  { %v582_v29 = vpop.permute.xlu1 %581 }
 0x479   :  { %v3482_v32 = vadd.f32 %v582_v29, %v574_v28  ;;  %v477_v37 = vpop.permute.xlu0 %476 }
 0x47a   :  { %v3484_v38 = vadd.f32 %v477_v37, %v469_v31  ;;  %v879_v37 = vsel %vm776_vm6, 1, %v3190_v11 }
 0x47b   :  { %3065 = vtanh.f32 %v3482_v32 }
 0x47c   :  { %3067 = vtanh.f32 %v3484_v38 }
 0x488   :  { %v3066_v42 = vpop.eup %3065 }
 0x489   :  { %v3068_v43 = vpop.eup %3067  ;;  %587 = vrot.lane.b32.xlu1 %v3066_v42, %s3191_s16  ;;  %v3558_v42 = vsel %vm307_vm3, %v3484_v38, 0.0 }
 0x48a   :  { %482 = vrot.lane.b32.xlu0 %v3068_v43, %s3191_s16 }
 0x48e   :  { %593 = vperm.xlu0 %3044, %v591_v30  }
 0x4fb   :  { %v588_v48 = vpop.permute.xlu1 %587 }
 0x4fc   :  { %v483_v44 = vpop.permute.xlu0 %482  ;;  %v590_v51 = vmul.f32 %v3062_v21, %v588_v48 }
 0x4fd   :  { %v485_v47 = vmul.f32 %v3064_v23, %v483_v44 }
 0x4ff   :  { %v3494_v50 = vsel %vm307_vm3, %v485_v47, 0.0 }
 0x500   :  { %599 = vrot.lane.b32.xlu1 %v3494_v50, %s3192_s17 }
 0x504   :  { %674 = vrot.lane.b32.xlu1 %v590_v51, %s3192_s17 }
 0x509   :  { %v3499_v52 = vpop.permute.xlu0 %593 }
 0x50a   :  { %vm595_vm5 = vcmp.eq.s32.totalorder %v3499_v52, 1 }
 0x50b   :  { %v3505_v53 = vsel %vm595_vm5, %v590_v51, %v3426_v49  ;;  %v3568_v47 = vsel %vm595_vm5, %v3482_v32, %v3479_v27 }
 0x50c   :  { %780 = vrot.lane.b32.xlu0 %v3505_v53, %s3192_s17 }
 0x572   :  { %v600_v60 = vpop.permute.xlu1 %599 }
 0x573   :  { %2533 = vst.msk [vmem:[%s4167_s8] sm:$0xff] %vm51_vm1, %v600_v60  ;;  %2826 = vmatmul.mubr.msk.f32.vlgmr.msra.gmra.mxu0 %vm51_vm1, %v600_v60 }
 0x574   :  { %2840 = vmatpush3.msra.mxu0 %v3259_v3  ;;  %2847 = vmatprep.mubr.msk.f32.mxu0 %vm3189_vm0, %v3188_v2 }
 0x575   :  { %2841 = vmatprep.subr.mxu0 %v3188_v2 }
 0x576   :  { %v675_v49 = vpop.permute.xlu1 %674  ;;  %2842 = vmatpush3.msra.mxu0 %v3267_v4 }
 0x577   :  { %2837 = vmatmul.mubr.msk.f32.vlgmr.msra.gmra.mxu1 %vm51_vm1, %v675_v49  ;;  %2843 = vmatprep.subr.mxu0 %v3188_v2 }
 0x578   :  { %2844 = vmatpush3.msra.mxu0 %v3280_v7  ;;  %2851 = vmatpush3.msra.mxu1 %v3341_v34 }
 0x579   :  { %2845 = vmatprep.subr.mxu0 %v3188_v2  ;;  %2852 = vmatprep.subr.mxu1 %v3188_v2 }
 0x57a   :  { %2846 = vmatpush3.msra.mxu0 %v3290_v9  ;;  %2853 = vmatpush3.msra.mxu1 %v3346_v35 }
 0x57b   :  { %2854 = vmatprep.subr.mxu1 %v3188_v2  ;;  %2861 = vmatprep.subr.mxu0 %v3188_v2 }
 0x57c   :  { %2855 = vmatpush3.msra.mxu1 %v3368_v39  ;;  %2858 = vmatprep.mubr.msk.f32.mxu1 %vm3189_vm0, %v3188_v2 }
 0x57d   :  { %2856 = vmatprep.subr.mxu1 %v3188_v2 }
 0x57e   :  { %v781_v62 = vpop.permute.xlu0 %780  ;;  %2857 = vmatpush3.msra.mxu1 %v3382_v41 }
 0x57f   :  { %2848 = vmatmul.mubr.msk.f32.vlgmr.msra.gmra.mxu0 %vm51_vm1, %v781_v62  ;;  %2872 = vmatprep.subr.mxu1 %v3188_v2 }
 0x580   :  { %2862 = vmatpush3.msra.mxu0 %v3335_v33  ;;  %2869 = vmatprep.mubr.msk.f32.mxu0 %vm3189_vm0, %v3188_v2 }
 0x581   :  { %2863 = vmatprep.subr.mxu0 %v3188_v2 }
 0x582   :  { %2864 = vmatpush3.msra.mxu0 %v3353_v36 }
 0x583   :  { %2865 = vmatprep.subr.mxu0 %v3188_v2 }
 0x584   :  { %2866 = vmatpush3.msra.mxu0 %v3375_v40 }
 0x585   :  { %2867 = vmatprep.subr.mxu0 %v3188_v2 }
 0x586   :  { %2868 = vmatpush3.msra.mxu0 %v3401_v45 }
 0x587   :  { %2883 = vmatprep.subr.mxu0 %v3188_v2 }
 0x633   :  { %v669_v63 = vpop.f32.mrf.mxu0 }
 0x635   :  { %v2827_v0 = vpop.f32.mrf.mxu0 }
 0x637   :  { %v744_v1 = vpop.f32.mrf.mxu1 }
 0x638   :  { %v745_v5 = vadd.f32 %v744_v1, %v669_v63 }
 0x639   :  { %v2838_v6 = vpop.f32.mrf.mxu1 }
 0x63a   :  { %v748_v8 = vadd.f32 %v3469_v61, %v745_v5 }
 0x63c   :  { %3069 = vtanh.f32 %v748_v8  ;;  %v2590_v19 = vmul.f32 -1.442695, %v748_v8 }
 0x63f   :  { %v850_v13 = vpop.f32.mrf.mxu0 }
 0x640   :  { %v854_v14 = vadd.f32 %v850_v13, %v153_v10 }
 0x641   :  { %v2849_v15 = vpop.f32.mrf.mxu0 }
 0x642   :  { %3071 = vtanh.f32 %v854_v14  ;;  %v2592_v20 = vmul.f32 -1.442695, %v854_v14  ;;  %v158_v14 = vadd.f32 %v3452_v54, %v3318_v16 }
 0x643   :  { %3073 = vpow2.f32 %v2590_v19 }
 0x644   :  { %3075 = vpow2.f32 %v2592_v20 }
 0x649   :  { %v3070_v17 = vpop.eup %3069 }
 0x64a   :  { %758 = vrot.lane.b32.xlu1 %v3070_v17, %s3191_s16 }
 0x64f   :  { %v3072_v18 = vpop.eup %3071 }
 0x650   :  { %864 = vrot.lane.b32.xlu0 %v3072_v18, %s3191_s16  ;;  %v3074_v21 = vpop.eup %3073 }
 0x651   :  { %v752_v22 = vadd.f32 1.0, %v3074_v21  ;;  %v3076_v23 = vpop.eup %3075 }
 0x652   :  { %v858_v24 = vadd.f32 1.0, %v3076_v23 }
 0x653   :  { %3077 = vrcp.f32 %v752_v22 }
 0x654   :  { %3079 = vrcp.f32 %v858_v24 }
 0x660   :  { %v3078_v55 = vpop.eup %3077 }
 0x661   :  { %v3080_v28 = vpop.eup %3079  ;;  %v756_v43 = vmul.f32 %v3078_v55, %v3558_v42 }
 0x662   :  { %v862_v48 = vmul.f32 %v3080_v28, %v3568_v47 }
 0x6bc   :  { %v759_v25 = vpop.permute.xlu1 %758 }
 0x6bd   :  { %v761_v26 = vmul.f32 %v3078_v55, %v759_v25 }
 0x6bf   :  { %763 = vrot.lane.b32.xlu1 %v761_v26, %s3192_s17 }
 0x6c2   :  { %v865_v29 = vpop.permute.xlu0 %864 }
 0x6c3   :  { %v867_v31 = vmul.f32 %v3080_v28, %v865_v29 }
 0x6c5   :  { %869 = vrot.lane.b32.xlu0 %v867_v31, %s3192_s17 }
 0x6c9   :  { %881 = vperm.xlu0 %3044, %v879_v37  }
 0x731   :  { %v764_v30 = vpop.permute.xlu1 %763 }
 0x732   :  { %v3561_v44 = vadd.f32 %v764_v30, %v756_v43 }
 0x734   :  { %3081 = vtanh.f32 %v3561_v44 }
 0x737   :  { %v870_v51 = vpop.permute.xlu0 %869 }
 0x738   :  { %v3571_v60 = vadd.f32 %v870_v51, %v862_v48  ;;  %v3641_v48 = vsel %vm595_vm5, %v3561_v44, %v3558_v42 }
 0x73a   :  { %3083 = vtanh.f32 %v3571_v60 }
 0x741   :  { %v3082_v46 = vpop.eup %3081 }
 0x742   :  { %769 = vrot.lane.b32.xlu1 %v3082_v46, %s3191_s16 }
 0x744   :  { %v3586_v32 = vpop.permute.xlu0 %881 }
 0x745   :  { %vm883_vm7 = vcmp.eq.s32.totalorder %v3586_v32, 1 }
 0x746   :  { %v3648_v46 = vsel %vm883_vm7, %v3571_v60, %v3568_v47  ;;  %v1167_v47 = vsel %vm1064_vm8, 1, %v3190_v11 }
 0x747   :  { %v3084_v38 = vpop.eup %3083 }
 0x748   :  { %875 = vrot.lane.b32.xlu1 %v3084_v38, %s3191_s16 }
 0x7b4   :  { %v770_v49 = vpop.permute.xlu1 %769 }
 0x7b5   :  { %v3576_v62 = vmul.f32 %v3078_v55, %v770_v49 }
 0x7b7   :  { %v3582_v27 = vsel %vm595_vm5, %v3576_v62, %v3494_v50 }
 0x7b8   :  { %887 = vrot.lane.b32.xlu0 %v3582_v27, %s3192_s17 }
 0x7ba   :  { %v876_v63 = vpop.permute.xlu1 %875 }
 0x7bb   :  { %v878_v0 = vmul.f32 %v3080_v28, %v876_v63 }
 0x7bd   :  { %962 = vrot.lane.b32.xlu1 %v878_v0, %s3192_s17  ;;  %v3593_v1 = vsel %vm883_vm7, %v878_v0, %v3505_v53 }
 0x7be   :  { %1068 = vrot.lane.b32.xlu0 %v3593_v1, %s3192_s17 }
 0x82a   :  { %v888_v50 = vpop.permute.xlu0 %887 }
 0x82b   :  { %2859 = vmatmul.mubr.msk.f32.vlgmr.msra.gmra.mxu1 %vm51_vm1, %v888_v50 }
 0x82c   :  { %2873 = vmatpush3.msra.mxu1 %v3259_v3  ;;  %2880 = vmatprep.mubr.msk.f32.mxu1 %vm3189_vm0, %v3188_v2 }
 0x82d   :  { %2874 = vmatprep.subr.mxu1 %v3188_v2 }
 0x82e   :  { %2875 = vmatpush3.msra.mxu1 %v3267_v4 }
 0x82f   :  { %2876 = vmatprep.subr.mxu1 %v3188_v2  ;;  %v963_v5 = vpop.permute.xlu1 %962 }
 0x830   :  { %2877 = vmatpush3.msra.mxu1 %v3280_v7  ;;  %2870 = vmatmul.mubr.msk.f32.vlgmr.msra.gmra.mxu0 %vm51_vm1, %v963_v5  ;;  %v1069_v53 = vpop.permute.xlu0 %1068 }
 0x831   :  { %2878 = vmatprep.subr.mxu1 %v3188_v2  ;;  %2884 = vmatpush3.msra.mxu0 %v3341_v34 }
 0x832   :  { %2879 = vmatpush3.msra.mxu1 %v3290_v9  ;;  %2885 = vmatprep.subr.mxu0 %v3188_v2 }
 0x833   :  { %2881 = vmatmul.mubr.msk.f32.vlgmr.msra.gmra.mxu1 %vm51_vm1, %v1069_v53  ;;  %2894 = vmatprep.subr.mxu1 %v3188_v2 }
 0x834   :  { %2895 = vmatpush3.msra.mxu1 %v3335_v33  ;;  %2886 = vmatpush3.msra.mxu0 %v3346_v35 }
 0x835   :  { %2896 = vmatprep.subr.mxu1 %v3188_v2  ;;  %2887 = vmatprep.subr.mxu0 %v3188_v2 }
 0x836   :  { %2897 = vmatpush3.msra.mxu1 %v3353_v36  ;;  %2888 = vmatpush3.msra.mxu0 %v3368_v39 }
 0x837   :  { %2898 = vmatprep.subr.mxu1 %v3188_v2  ;;  %2889 = vmatprep.subr.mxu0 %v3188_v2 }
 0x838   :  { %2899 = vmatpush3.msra.mxu1 %v3375_v40  ;;  %2902 = vmatprep.mubr.msk.f32.mxu1 %vm3189_vm0, %v3188_v2 }
 0x839   :  { %2900 = vmatprep.subr.mxu1 %v3188_v2  ;;  %2890 = vmatpush3.msra.mxu0 %v3382_v41 }
 0x83a   :  { %2901 = vmatpush3.msra.mxu1 %v3401_v45  ;;  %2891 = vmatprep.mubr.msk.f32.mxu0 %vm3189_vm0, %v3188_v2 }
 0x83b   :  { %2905 = vmatprep.subr.mxu0 %v3188_v2  ;;  %2916 = vmatprep.subr.mxu1 %v3188_v2 }
 0x8eb   :  { %v957_v6 = vpop.f32.mrf.mxu1 }
 0x8ed   :  { %v2860_v8 = vpop.f32.mrf.mxu1 }
 0x8f0   :  { %v1032_v10 = vpop.f32.mrf.mxu0 }
 0x8f1   :  { %v1033_v13 = vadd.f32 %v1032_v10, %v957_v6 }
 0x8f2   :  { %v2871_v15 = vpop.f32.mrf.mxu0 }
 0x8f3   :  { %v1036_v17 = vadd.f32 %v3469_v61, %v1033_v13  ;;  %v1138_v18 = vpop.f32.mrf.mxu1 }
 0x8f4   :  { %v1142_v19 = vadd.f32 %v1138_v18, %v158_v14 }
 0x8f5   :  { %3085 = vtanh.f32 %v1036_v17  ;;  %v2882_v20 = vpop.f32.mrf.mxu1  ;;  %v2595_v23 = vmul.f32 -1.442695, %v1036_v17 }
 0x8f6   :  { %3087 = vtanh.f32 %v1142_v19  ;;  %v2597_v24 = vmul.f32 -1.442695, %v1142_v19 }
 0x8f7   :  { %3089 = vpow2.f32 %v2595_v23 }
 0x8f8   :  { %3091 = vpow2.f32 %v2597_v24 }
 0x902   :  { %v3086_v21 = vpop.eup %3085 }
 0x903   :  { %v3088_v22 = vpop.eup %3087  ;;  %1046 = vrot.lane.b32.xlu1 %v3086_v21, %s3191_s16 }
 0x904   :  { %1152 = vrot.lane.b32.xlu0 %v3088_v22, %s3191_s16  ;;  %v3090_v55 = vpop.eup %3089  ;;  %v163_v22 = vadd.f32 %v3318_v16, %v3458_v57 }
 0x905   :  { %v3092_v54 = vpop.eup %3091  ;;  %v1040_v25 = vadd.f32 1.0, %v3090_v55 }
 0x906   :  { %v1146_v26 = vadd.f32 1.0, %v3092_v54 }
 0x907   :  { %3093 = vrcp.f32 %v1040_v25 }
 0x908   :  { %3095 = vrcp.f32 %v1146_v26 }
 0x914   :  { %v3094_v28 = vpop.eup %3093 }
 0x915   :  { %v3096_v31 = vpop.eup %3095  ;;  %v1044_v51 = vmul.f32 %v3094_v28, %v3641_v48 }
 0x916   :  { %v1150_v49 = vmul.f32 %v3096_v31, %v3648_v46 }
 0x975   :  { %v1047_v29 = vpop.permute.xlu1 %1046 }
 0x976   :  { %v1049_v37 = vmul.f32 %v3094_v28, %v1047_v29  ;;  %v1153_v43 = vpop.permute.xlu0 %1152 }
 0x977   :  { %v1155_v30 = vmul.f32 %v3096_v31, %v1153_v43 }
 0x978   :  { %1051 = vrot.lane.b32.xlu1 %v1049_v37, %s3192_s17 }
 0x979   :  { %1157 = vrot.lane.b32.xlu0 %v1155_v30, %s3192_s17 }
 0x9ea   :  { %v1052_v38 = vpop.permute.xlu1 %1051 }
 0x9eb   :  { %v3651_v63 = vadd.f32 %v1052_v38, %v1044_v51  ;;  %v1158_v0 = vpop.permute.xlu0 %1157 }
 0x9ec   :  { %v3653_v50 = vadd.f32 %v1158_v0, %v1150_v49 }
 0x9ed   :  { %3097 = vtanh.f32 %v3651_v63 }
 0x9ee   :  { %3099 = vtanh.f32 %v3653_v50 }
 0x9fa   :  { %v3098_v42 = vpop.eup %3097 }
 0x9fb   :  { %v3100_v44 = vpop.eup %3099  ;;  %1057 = vrot.lane.b32.xlu1 %v3098_v42, %s3191_s16  ;;  %v1455_v42 = vsel %vm1352_vm10, 1, %v3190_v11 }
 0x9fc   :  { %1163 = vrot.lane.b32.xlu0 %v3100_v44, %s3191_s16  ;;  %v3728_v44 = vsel %vm883_vm7, %v3651_v63, %v3641_v48 }
 0x9ff   :  { %1169 = vperm.xlu1 %3043, %v1167_v47  }
 0xa6d   :  { %v1058_v60 = vpop.permute.xlu1 %1057 }
 0xa6e   :  { %v3661_v5 = vmul.f32 %v3094_v28, %v1058_v60  ;;  %v1164_v53 = vpop.permute.xlu0 %1163 }
 0xa6f   :  { %v1166_v6 = vmul.f32 %v3096_v31, %v1164_v53 }
 0xa70   :  { %v3667_v8 = vsel %vm883_vm7, %v3661_v5, %v3582_v27 }
 0xa71   :  { %1250 = vrot.lane.b32.xlu1 %v1166_v6, %s3192_s17  ;;  %1175 = vrot.lane.b32.xlu0 %v3667_v8, %s3192_s17 }
 0xa7a   :  { %v3672_v10 = vpop.permute.xlu1 %1169 }
 0xa7b   :  { %vm1171_vm9 = vcmp.eq.s32.totalorder %v3672_v10, 1 }
 0xa7c   :  { %v3678_v13 = vsel %vm1171_vm9, %v1166_v6, %v3593_v1  ;;  %v3738_v12 = vsel %vm1171_vm9, %v3653_v50, %v3648_v46 }
 0xa7d   :  { %1356 = vrot.lane.b32.xlu0 %v3678_v13, %s3192_s17 }
 0xae3   :  { %v1251_v14 = vpop.permute.xlu1 %1250  ;;  %v1176_v27 = vpop.permute.xlu0 %1175 }
 0xae4   :  { %2903 = vmatmul.mubr.msk.f32.vlgmr.msra.gmra.mxu1 %vm51_vm1, %v1251_v14  ;;  %2892 = vmatmul.mubr.msk.f32.vlgmr.msra.gmra.mxu0 %vm51_vm1, %v1176_v27 }
 0xae5   :  { %2906 = vmatpush3.msra.mxu0 %v3259_v3  ;;  %2913 = vmatprep.mubr.msk.f32.mxu0 %vm3189_vm0, %v3188_v2 }
 0xae6   :  { %2907 = vmatprep.subr.mxu0 %v3188_v2  ;;  %2917 = vmatpush3.msra.mxu1 %v3341_v34 }
 0xae7   :  { %2908 = vmatpush3.msra.mxu0 %v3267_v4  ;;  %2918 = vmatprep.subr.mxu1 %v3188_v2 }
 0xae8   :  { %2909 = vmatprep.subr.mxu0 %v3188_v2  ;;  %2919 = vmatpush3.msra.mxu1 %v3346_v35 }
 0xae9   :  { %2910 = vmatpush3.msra.mxu0 %v3280_v7  ;;  %2920 = vmatprep.subr.mxu1 %v3188_v2 }
 0xaea   :  { %2911 = vmatprep.subr.mxu0 %v3188_v2  ;;  %2921 = vmatpush3.msra.mxu1 %v3368_v39 }
 0xaeb   :  { %2912 = vmatpush3.msra.mxu0 %v3290_v9  ;;  %2922 = vmatprep.subr.mxu1 %v3188_v2 }
 0xaec   :  { %2923 = vmatpush3.msra.mxu1 %v3382_v41  ;;  %2924 = vmatprep.mubr.msk.f32.mxu1 %vm3189_vm0, %v3188_v2 }
 0xaed   :  { %2927 = vmatprep.subr.mxu0 %v3188_v2  ;;  %2938 = vmatprep.subr.mxu1 %v3188_v2 }
 0xaef   :  { %v1357_v1 = vpop.permute.xlu0 %1356 }
 0xaf0   :  { %2914 = vmatmul.mubr.msk.f32.vlgmr.msra.gmra.mxu0 %vm51_vm1, %v1357_v1 }
 0xaf1   :  { %2928 = vmatpush3.msra.mxu0 %v3335_v33  ;;  %2935 = vmatprep.mubr.msk.f32.mxu0 %vm3189_vm0, %v3188_v2 }
 0xaf2   :  { %2929 = vmatprep.subr.mxu0 %v3188_v2 }
 0xaf3   :  { %2930 = vmatpush3.msra.mxu0 %v3353_v36 }
 0xaf4   :  { %2931 = vmatprep.subr.mxu0 %v3188_v2 }
 0xaf5   :  { %2932 = vmatpush3.msra.mxu0 %v3375_v40 }
 0xaf6   :  { %2933 = vmatprep.subr.mxu0 %v3188_v2 }
 0xaf7   :  { %2934 = vmatpush3.msra.mxu0 %v3401_v45 }
 0xaf8   :  { %2949 = vmatprep.subr.mxu0 %v3188_v2 }
 0xba4   :  { %v1320_v15 = vpop.f32.mrf.mxu1  ;;  %v1245_v17 = vpop.f32.mrf.mxu0 }
 0xba5   :  { %v1321_v18 = vadd.f32 %v1320_v15, %v1245_v17 }
 0xba6   :  { %v2904_v19 = vpop.f32.mrf.mxu1  ;;  %v2893_v20 = vpop.f32.mrf.mxu0 }
 0xba7   :  { %v1324_v21 = vadd.f32 %v3469_v61, %v1321_v18 }
 0xba9   :  { %3101 = vtanh.f32 %v1324_v21  ;;  %v2600_v26 = vmul.f32 -1.442695, %v1324_v21 }
 0xbb0   :  { %v1426_v23 = vpop.f32.mrf.mxu0 }
 0xbb1   :  { %v1430_v24 = vadd.f32 %v1426_v23, %v163_v22 }
 0xbb2   :  { %v2915_v55 = vpop.f32.mrf.mxu0 }
 0xbb3   :  { %3103 = vtanh.f32 %v1430_v24  ;;  %v2602_v28 = vmul.f32 -1.442695, %v1430_v24 }
 0xbb4   :  { %3105 = vpow2.f32 %v2600_v26 }
 0xbb5   :  { %3107 = vpow2.f32 %v2602_v28 }
 0xbb6   :  { %v3102_v54 = vpop.eup %3101 }
 0xbb7   :  { %1334 = vrot.lane.b32.xlu1 %v3102_v54, %s3191_s16 }
 0xbc0   :  { %v3104_v25 = vpop.eup %3103 }
 0xbc1   :  { %1440 = vrot.lane.b32.xlu0 %v3104_v25, %s3191_s16  ;;  %v3106_v29 = vpop.eup %3105 }
 0xbc2   :  { %v1328_v31 = vadd.f32 1.0, %v3106_v29  ;;  %v3108_v37 = vpop.eup %3107 }
 0xbc3   :  { %v1434_v43 = vadd.f32 1.0, %v3108_v37 }
 0xbc4   :  { %3109 = vrcp.f32 %v1328_v31 }
 0xbc5   :  { %3111 = vrcp.f32 %v1434_v43 }
 0xbd1   :  { %v3110_v57 = vpop.eup %3109 }
 0xbd2   :  { %v3112_v38 = vpop.eup %3111  ;;  %v1332_v47 = vmul.f32 %v3110_v57, %v3728_v44 }
 0xbd3   :  { %v1438_v6 = vmul.f32 %v3112_v38, %v3738_v12 }
 0xc29   :  { %v1335_v30 = vpop.permute.xlu1 %1334 }
 0xc2a   :  { %v1337_v51 = vmul.f32 %v3110_v57, %v1335_v30 }
 0xc2c   :  { %1339 = vrot.lane.b32.xlu1 %v1337_v51, %s3192_s17 }
 0xc33   :  { %v1441_v49 = vpop.permute.xlu0 %1440 }
 0xc34   :  { %v1443_v0 = vmul.f32 %v3112_v38, %v1441_v49 }
 0xc36   :  { %1445 = vrot.lane.b32.xlu0 %v1443_v0, %s3192_s17 }
 0xc3a   :  { %1457 = vperm.xlu0 %3044, %v1455_v42   ;;  %v3830_v42 = vld [vmem:[%s4162_s0] sm:$0xff] }
 0xc3b   :  { %vm1640_vm12 = vcmp.gt.s32.totalorder %v3830_v42, 5  ;;  %vm1928_vm14 = vcmp.gt.s32.totalorder %v3830_v42, 6 }
 0xc9e   :  { %v1340_v60 = vpop.permute.xlu1 %1339 }
 0xc9f   :  { %v3731_v53 = vadd.f32 %v1340_v60, %v1332_v47  ;;  %v1743_v47 = vsel %vm1640_vm12, 1, %v3190_v11 }
 0xca1   :  { %3113 = vtanh.f32 %v3731_v53  ;;  %v3818_v43 = vsel %vm1171_vm9, %v3731_v53, %v3728_v44 }
 0xca8   :  { %v1446_v14 = vpop.permute.xlu0 %1445 }
 0xca9   :  { %v3741_v27 = vadd.f32 %v1446_v14, %v1438_v6 }
 0xcab   :  { %3115 = vtanh.f32 %v3741_v27 }
 0xcae   :  { %v3114_v48 = vpop.eup %3113 }
 0xcaf   :  { %1345 = vrot.lane.b32.xlu1 %v3114_v48, %s3191_s16 }
 0xcb5   :  { %v3756_v50 = vpop.permute.xlu0 %1457 }
 0xcb6   :  { %vm1459_vm11 = vcmp.eq.s32.totalorder %v3756_v50, 1 }
 0xcb7   :  { %v3811_v31 = vsel %vm1459_vm11, %v3741_v27, %v3738_v12 }
 0xcb8   :  { %v3116_v63 = vpop.eup %3115 }
 0xcb9   :  { %1451 = vrot.lane.b32.xlu1 %v3116_v63, %s3191_s16 }
 0xd21   :  { %v1346_v1 = vpop.permute.xlu1 %1345 }
 0xd22   :  { %v3746_v15 = vmul.f32 %v3110_v57, %v1346_v1 }
 0xd24   :  { %v3752_v46 = vsel %vm1171_vm9, %v3746_v15, %v3667_v8 }
 0xd25   :  { %1463 = vrot.lane.b32.xlu0 %v3752_v46, %s3192_s17 }
 0xd2b   :  { %v1452_v17 = vpop.permute.xlu1 %1451 }
 0xd2c   :  { %v1454_v18 = vmul.f32 %v3112_v38, %v1452_v17  ;;  %v3871_v17 = vld [vmem:[%s4160_s3 + $0x18] sm:$0xff] }
 0xd2e   :  { %1538 = vrot.lane.b32.xlu1 %v1454_v18, %s3192_s17  ;;  %v3763_v19 = vsel %vm1459_vm11, %v1454_v18, %v3678_v13  ;;  %v3880_v18 = vld [vmem:[%s4165_s6 + $0x10] sm:$0xff] }
 0xd2f   :  { %1644 = vrot.lane.b32.xlu0 %v3763_v19, %s3192_s17 }
 0xd97   :  { %v1464_v8 = vpop.permute.xlu0 %1463 }
 0xd98   :  { %2925 = vmatmul.mubr.msk.f32.vlgmr.msra.gmra.mxu1 %vm51_vm1, %v1464_v8  ;;  %v3894_v8 = vld [vmem:[%s4165_s6 + $0x8] sm:$0xff] }
 0xd99   :  { %2939 = vmatpush3.msra.mxu1 %v3259_v3  ;;  %2946 = vmatprep.mubr.msk.f32.mxu1 %vm3189_vm0, %v3188_v2 }
 0xd9a   :  { %2940 = vmatprep.subr.mxu1 %v3188_v2 }
 0xd9b   :  { %2941 = vmatpush3.msra.mxu1 %v3267_v4 }
 0xd9c   :  { %2942 = vmatprep.subr.mxu1 %v3188_v2 }
 0xd9d   :  { %2943 = vmatpush3.msra.mxu1 %v3280_v7 }
 0xd9e   :  { %2944 = vmatprep.subr.mxu1 %v3188_v2 }
 0xd9f   :  { %2945 = vmatpush3.msra.mxu1 %v3290_v9  ;;  %v168_v9 = vadd.f32 %v3456_v56, %v3318_v16 }
 0xda0   :  { %v1539_v13 = vpop.permute.xlu1 %1538  ;;  %2960 = vmatprep.subr.mxu1 %v3188_v2 }
 0xda1   :  { %2936 = vmatmul.mubr.msk.f32.vlgmr.msra.gmra.mxu0 %vm51_vm1, %v1539_v13  ;;  %v1645_v3 = vpop.permute.xlu0 %1644  ;;  %v3900_v13 = vld [vmem:[%s4160_s3 + $0x8] sm:$0xff] }
 0xda2   :  { %2947 = vmatmul.mubr.msk.f32.vlgmr.msra.gmra.mxu1 %vm51_vm1, %v1645_v3  ;;  %2950 = vmatpush3.msra.mxu0 %v3341_v34  ;;  %v3908_v3 = vld [vmem:[%s4165_s6] sm:$0xff] }
 0xda3   :  { %2961 = vmatpush3.msra.mxu1 %v3335_v33  ;;  %2951 = vmatprep.subr.mxu0 %v3188_v2 }
 0xda4   :  { %2962 = vmatprep.subr.mxu1 %v3188_v2  ;;  %2952 = vmatpush3.msra.mxu0 %v3346_v35 }
 0xda5   :  { %2963 = vmatpush3.msra.mxu1 %v3353_v36  ;;  %2953 = vmatprep.subr.mxu0 %v3188_v2 }
 0xda6   :  { %2964 = vmatprep.subr.mxu1 %v3188_v2  ;;  %2954 = vmatpush3.msra.mxu0 %v3368_v39 }
 0xda7   :  { %2965 = vmatpush3.msra.mxu1 %v3375_v40  ;;  %2968 = vmatprep.mubr.msk.f32.mxu1 %vm3189_vm0, %v3188_v2 }
 0xda8   :  { %2966 = vmatprep.subr.mxu1 %v3188_v2  ;;  %2955 = vmatprep.subr.mxu0 %v3188_v2 }
 0xda9   :  { %2967 = vmatpush3.msra.mxu1 %v3401_v45  ;;  %2956 = vmatpush3.msra.mxu0 %v3382_v41 }
 0xdaa   :  { %2957 = vmatprep.mubr.msk.f32.mxu0 %vm3189_vm0, %v3188_v2  ;;  %2971 = vmatprep.subr.mxu0 %v3188_v2 }
 0xdab   :  { %2982 = vmatprep.subr.mxu1 %v3188_v2 }
 0xe58   :  { %v1533_v4 = vpop.f32.mrf.mxu1 }
 0xe5a   :  { %v2926_v7 = vpop.f32.mrf.mxu1 }
 0xe61   :  { %v1608_v33 = vpop.f32.mrf.mxu0 }
 0xe62   :  { %v1609_v34 = vadd.f32 %v1608_v33, %v1533_v4  ;;  %v1714_v35 = vpop.f32.mrf.mxu1  ;;  %v3914_v4 = vld [vmem:[%s4160_s3] sm:$0xff]  ;;  %v3932_v33 = vld [vmem:[%s4164_s5 + $0x10] sm:$0xff] }
 0xe63   :  { %v1718_v36 = vadd.f32 %v1714_v35, %v168_v9  ;;  %v2937_v39 = vpop.f32.mrf.mxu0  ;;  %v3923_v9 = vld [vmem:[%s4164_s5 + $0x18] sm:$0xff]  ;;  %v3946_v35 = vld [vmem:[%s4164_s5] sm:$0xff] }
 0xe64   :  { %v1612_v40 = vadd.f32 %v3469_v61, %v1609_v34  ;;  %v2948_v41 = vpop.f32.mrf.mxu1  ;;  %v3939_v34 = vld [vmem:[%s4164_s5 + $0x8] sm:$0xff] }
 0xe65   :  { %3117 = vtanh.f32 %v1718_v36  ;;  %v2607_v21 = vmul.f32 -1.442695, %v1718_v36 }
 0xe66   :  { %3119 = vtanh.f32 %v1612_v40  ;;  %v2605_v22 = vmul.f32 -1.442695, %v1612_v40 }
 0xe67   :  { %3121 = vpow2.f32 %v2607_v21  ;;  %v3954_v21 = vld [vmem:[%s4163_s4] ss:$0 sm:$0xff] }
 0xe68   :  { %3123 = vpow2.f32 %v2605_v22  ;;  %v173_v22 = vadd.f32 %v3954_v21, %v3462_v59 }
 0xe72   :  { %v3118_v45 = vpop.eup %3117 }
 0xe73   :  { %v3120_v20 = vpop.eup %3119  ;;  %1728 = vrot.lane.b32.xlu0 %v3118_v45, %s3191_s16 }
 0xe74   :  { %1622 = vrot.lane.b32.xlu1 %v3120_v20, %s3191_s16  ;;  %v3122_v16 = vpop.eup %3121 }
 0xe75   :  { %v3124_v56 = vpop.eup %3123  ;;  %v1722_v23 = vadd.f32 1.0, %v3122_v16 }
 0xe76   :  { %v1616_v24 = vadd.f32 1.0, %v3124_v56 }
 0xe77   :  { %3125 = vrcp.f32 %v1722_v23 }
 0xe78   :  { %3127 = vrcp.f32 %v1616_v24 }
 0xe84   :  { %v3126_v55 = vpop.eup %3125 }
 0xe85   :  { %v3128_v25 = vpop.eup %3127  ;;  %v1726_v37 = vmul.f32 %v3126_v55, %v3811_v31 }
 0xe86   :  { %v1620_v30 = vmul.f32 %v3128_v25, %v3818_v43 }
 0xee5   :  { %v1729_v54 = vpop.permute.xlu0 %1728 }
 0xee6   :  { %v1731_v26 = vmul.f32 %v3126_v55, %v1729_v54  ;;  %v1623_v28 = vpop.permute.xlu1 %1622 }
 0xee7   :  { %v1625_v29 = vmul.f32 %v3128_v25, %v1623_v28 }
 0xee8   :  { %1733 = vrot.lane.b32.xlu0 %v1731_v26, %s3192_s17 }
 0xee9   :  { %1627 = vrot.lane.b32.xlu1 %v1625_v29, %s3192_s17 }
 0xf5a   :  { %v1734_v57 = vpop.permute.xlu0 %1733 }
 0xf5b   :  { %v3821_v51 = vadd.f32 %v1734_v57, %v1726_v37  ;;  %v1628_v38 = vpop.permute.xlu1 %1627 }
 0xf5c   :  { %v3823_v49 = vadd.f32 %v1628_v38, %v1620_v30 }
 0xf5d   :  { %3129 = vtanh.f32 %v3821_v51 }
 0xf5e   :  { %3131 = vtanh.f32 %v3823_v49 }
 0xf6a   :  { %v3130_v0 = vpop.eup %3129 }
 0xf6b   :  { %v3132_v44 = vpop.eup %3131  ;;  %1739 = vrot.lane.b32.xlu0 %v3130_v0, %s3191_s16 }
 0xf6c   :  { %1633 = vrot.lane.b32.xlu1 %v3132_v44, %s3191_s16  ;;  %v2031_v44 = vsel %vm1928_vm14, 1, %v3190_v11 }
 0xf70   :  { %1745 = vperm.xlu1 %3043, %v1743_v47   ;;  %v3968_v47 = vsel %vm1459_vm11, %v3823_v49, %v3818_v43 }
 0xfdd   :  { %v1740_v60 = vpop.permute.xlu0 %1739 }
 0xfde   :  { %v1742_v53 = vmul.f32 %v3126_v55, %v1740_v60  ;;  %v1634_v12 = vpop.permute.xlu1 %1633 }
 0xfdf   :  { %v3836_v6 = vmul.f32 %v3128_v25, %v1634_v12 }
 0xfe0   :  { %1826 = vrot.lane.b32.xlu1 %v1742_v53, %s3192_s17 }
 0xfe1   :  { %v3843_v14 = vsel %vm1459_vm11, %v3836_v6, %v3752_v46  ;;  %v3861_v46 = vld [vmem:[%s4165_s6 + $0x18] sm:$0xff] }
 0xfe2   :  { %1751 = vrot.lane.b32.xlu0 %v3843_v14, %s3192_s17 }
 0xfeb   :  { %v3847_v27 = vpop.permute.xlu1 %1745 }
 0xfec   :  { %vm1747_vm13 = vcmp.eq.s32.totalorder %v3847_v27, 1 }
 0xfed   :  { %v3853_v48 = vsel %vm1747_vm13, %v1742_v53, %v3763_v19  ;;  %v3886_v19 = vld [vmem:[%s4160_s3 + $0x10] sm:$0xff] }
 0xfee   :  { %1932 = vrot.lane.b32.xlu0 %v3853_v48, %s3192_s17 }
0x1052   :  { %v1827_v63 = vpop.permute.xlu1 %1826 }
0x1053   :  { %2969 = vmatmul.mubr.msk.f32.vlgmr.msra.gmra.mxu1 %vm51_vm1, %v1827_v63  ;;  %v3978_v63 = vsel %vm1747_vm13, %v3821_v51, %v3811_v31 }
0x1054   :  { %v1752_v1 = vpop.permute.xlu0 %1751  ;;  %2983 = vmatpush3.msra.mxu1 %v3861_v46  ;;  %2990 = vmatprep.mubr.msk.f32.mxu1 %vm3189_vm0, %v3188_v2 }
0x1055   :  { %2958 = vmatmul.mubr.msk.f32.vlgmr.msra.gmra.mxu0 %vm51_vm1, %v1752_v1  ;;  %2984 = vmatprep.subr.mxu1 %v3188_v2 }
0x1056   :  { %2972 = vmatpush3.msra.mxu0 %v3871_v17  ;;  %2979 = vmatprep.mubr.msk.f32.mxu0 %vm3189_vm0, %v3188_v2 }
0x1057   :  { %2973 = vmatprep.subr.mxu0 %v3188_v2  ;;  %2985 = vmatpush3.msra.mxu1 %v3880_v18 }
0x1058   :  { %2974 = vmatpush3.msra.mxu0 %v3886_v19  ;;  %2986 = vmatprep.subr.mxu1 %v3188_v2 }
0x1059   :  { %2975 = vmatprep.subr.mxu0 %v3188_v2  ;;  %2987 = vmatpush3.msra.mxu1 %v3894_v8 }
0x105a   :  { %2976 = vmatpush3.msra.mxu0 %v3900_v13  ;;  %2988 = vmatprep.subr.mxu1 %v3188_v2 }
0x105b   :  { %2977 = vmatprep.subr.mxu0 %v3188_v2  ;;  %2989 = vmatpush3.msra.mxu1 %v3908_v3 }
0x105c   :  { %2978 = vmatpush3.msra.mxu0 %v3914_v4  ;;  %3004 = vmatprep.subr.mxu1 %v3188_v2 }
0x105d   :  { %2993 = vmatprep.subr.mxu0 %v3188_v2 }
0x1060   :  { %v1933_v7 = vpop.permute.xlu0 %1932 }
0x1061   :  { %2980 = vmatmul.mubr.msk.f32.vlgmr.msra.gmra.mxu0 %vm51_vm1, %v1933_v7 }
0x1062   :  { %2994 = vmatpush3.msra.mxu0 %v3923_v9  ;;  %3001 = vmatprep.mubr.msk.f32.mxu0 %vm3189_vm0, %v3188_v2 }
0x1063   :  { %2995 = vmatprep.subr.mxu0 %v3188_v2 }
0x1064   :  { %2996 = vmatpush3.msra.mxu0 %v3932_v33 }
0x1065   :  { %2997 = vmatprep.subr.mxu0 %v3188_v2 }
0x1066   :  { %2998 = vmatpush3.msra.mxu0 %v3939_v34 }
0x1067   :  { %2999 = vmatprep.subr.mxu0 %v3188_v2 }
0x1068   :  { %3000 = vmatpush3.msra.mxu0 %v3946_v35 }
0x1069   :  { %3015 = vmatprep.subr.mxu0 %v3188_v2 }
0x1113   :  { %v1896_v36 = vpop.f32.mrf.mxu1 }
0x1115   :  { %v1821_v39 = vpop.f32.mrf.mxu0  ;;  %v2970_v40 = vpop.f32.mrf.mxu1 }
0x1116   :  { %v1897_v41 = vadd.f32 %v1896_v36, %v1821_v39 }
0x1117   :  { %v2959_v45 = vpop.f32.mrf.mxu0 }
0x1118   :  { %v1900_v20 = vadd.f32 %v3469_v61, %v1897_v41 }
0x111a   :  { %3133 = vtanh.f32 %v1900_v20  ;;  %v2610_v61 = vmul.f32 -1.442695, %v1900_v20 }
0x1121   :  { %v2002_v16 = vpop.f32.mrf.mxu0 }
0x1122   :  { %v2006_v56 = vadd.f32 %v2002_v16, %v173_v22 }
0x1123   :  { %v2981_v23 = vpop.f32.mrf.mxu0 }
0x1124   :  { %3135 = vtanh.f32 %v2006_v56  ;;  %v2612_v54 = vmul.f32 -1.442695, %v2006_v56 }
0x1125   :  { %3137 = vpow2.f32 %v2610_v61 }
0x1126   :  { %3139 = vpow2.f32 %v2612_v54 }
0x1127   :  { %v3134_v24 = vpop.eup %3133 }
0x1128   :  { %1910 = vrot.lane.b32.xlu1 %v3134_v24, %s3191_s16 }
0x1131   :  { %v3136_v55 = vpop.eup %3135 }
0x1132   :  { %2016 = vrot.lane.b32.xlu0 %v3136_v55, %s3191_s16  ;;  %v3138_v25 = vpop.eup %3137 }
0x1133   :  { %v1904_v26 = vadd.f32 1.0, %v3138_v25  ;;  %v3140_v28 = vpop.eup %3139 }
0x1134   :  { %v2010_v29 = vadd.f32 1.0, %v3140_v28 }
0x1135   :  { %3141 = vrcp.f32 %v1904_v26 }
0x1136   :  { %3143 = vrcp.f32 %v2010_v29 }
0x1142   :  { %v3142_v59 = vpop.eup %3141 }
0x1143   :  { %v3144_v30 = vpop.eup %3143  ;;  %v1908_v60 = vmul.f32 %v3142_v59, %v3968_v47 }
0x1144   :  { %v2014_v1 = vmul.f32 %v3144_v30, %v3978_v63 }
0x119a   :  { %v1911_v37 = vpop.permute.xlu1 %1910 }
0x119b   :  { %v1913_v57 = vmul.f32 %v3142_v59, %v1911_v37 }
0x119d   :  { %1915 = vrot.lane.b32.xlu1 %v1913_v57, %s3192_s17 }
0x11a4   :  { %v2017_v38 = vpop.permute.xlu0 %2016 }
0x11a5   :  { %v2019_v0 = vmul.f32 %v3144_v30, %v2017_v38 }
0x11a7   :  { %2021 = vrot.lane.b32.xlu0 %v2019_v0, %s3192_s17 }
0x11ab   :  { %2033 = vperm.xlu0 %3044, %v2031_v44  }
0x120f   :  { %v1916_v53 = vpop.permute.xlu1 %1915 }
0x1210   :  { %v3971_v12 = vadd.f32 %v1916_v53, %v1908_v60 }
0x1212   :  { %3145 = vtanh.f32 %v3971_v12  ;;  %v1926_v37 = vsel %vm1747_vm13, %v3971_v12, %v3968_v47 }
0x1219   :  { %v2022_v7 = vpop.permute.xlu0 %2021 }
0x121a   :  { %v3981_v36 = vadd.f32 %v2022_v7, %v2014_v1 }
0x121c   :  { %3147 = vtanh.f32 %v3981_v36 }
0x121f   :  { %v3146_v43 = vpop.eup %3145 }
0x1220   :  { %1921 = vrot.lane.b32.xlu1 %v3146_v43, %s3191_s16 }
0x1226   :  { %v3996_v51 = vpop.permute.xlu0 %2033 }
0x1227   :  { %vm2035_vm15 = vcmp.eq.s32.totalorder %v3996_v51, 1 }
0x1228   :  { %v4051_v29 = vsel %vm2035_vm15, %v3981_v36, %v3978_v63 }
0x1229   :  { %v3148_v49 = vpop.eup %3147 }
0x122a   :  { %2027 = vrot.lane.b32.xlu1 %v3148_v49, %s3191_s16 }
0x1292   :  { %v1922_v39 = vpop.permute.xlu1 %1921 }
0x1293   :  { %v3986_v40 = vmul.f32 %v3142_v59, %v1922_v39 }
0x1295   :  { %v3992_v31 = vsel %vm1747_vm13, %v3986_v40, %v3843_v14 }
0x1296   :  { %2039 = vrot.lane.b32.xlu0 %v3992_v31, %s3192_s17 }
0x129c   :  { %v2028_v41 = vpop.permute.xlu1 %2027 }
0x129d   :  { %v2030_v45 = vmul.f32 %v3144_v30, %v2028_v41 }
0x129f   :  { %2114 = vrot.lane.b32.xlu1 %v2030_v45, %s3192_s17  ;;  %v4003_v20 = vsel %vm2035_vm15, %v2030_v45, %v3853_v48 }
0x12a0   :  { %2220 = vrot.lane.b32.xlu0 %v4003_v20, %s3192_s17 }
0x1308   :  { %v2040_v14 = vpop.permute.xlu0 %2039 }
0x1309   :  { %2991 = vmatmul.mubr.msk.f32.vlgmr.msra.gmra.mxu1 %vm51_vm1, %v2040_v14 }
0x130a   :  { %3005 = vmatpush3.msra.mxu1 %v3871_v17  ;;  %3012 = vmatprep.mubr.msk.f32.mxu1 %vm3189_vm0, %v3188_v2 }
0x130b   :  { %3006 = vmatprep.subr.mxu1 %v3188_v2 }
0x130c   :  { %3007 = vmatpush3.msra.mxu1 %v3886_v19  ;;  %v178_v19 = vadd.f32 %v3954_v21, %v3460_v58 }
0x130d   :  { %3008 = vmatprep.subr.mxu1 %v3188_v2 }
0x130e   :  { %3009 = vmatpush3.msra.mxu1 %v3900_v13 }
0x130f   :  { %3010 = vmatprep.subr.mxu1 %v3188_v2 }
0x1310   :  { %3011 = vmatpush3.msra.mxu1 %v3914_v4 }
0x1311   :  { %v2115_v48 = vpop.permute.xlu1 %2114  ;;  %3026 = vmatprep.subr.mxu1 %v3188_v2 }
0x1312   :  { %3002 = vmatmul.mubr.msk.f32.vlgmr.msra.gmra.mxu0 %vm51_vm1, %v2115_v48  ;;  %v2221_v17 = vpop.permute.xlu0 %2220 }
0x1313   :  { %3013 = vmatmul.mubr.msk.f32.vlgmr.msra.gmra.mxu1 %vm51_vm1, %v2221_v17  ;;  %3016 = vmatpush3.msra.mxu0 %v3861_v46 }
0x1314   :  { %3027 = vmatpush3.msra.mxu1 %v3923_v9  ;;  %3017 = vmatprep.subr.mxu0 %v3188_v2 }
0x1315   :  { %3028 = vmatprep.subr.mxu1 %v3188_v2  ;;  %3018 = vmatpush3.msra.mxu0 %v3880_v18 }
0x1316   :  { %3029 = vmatpush3.msra.mxu1 %v3932_v33  ;;  %3019 = vmatprep.subr.mxu0 %v3188_v2 }
0x1317   :  { %3030 = vmatprep.subr.mxu1 %v3188_v2  ;;  %3020 = vmatpush3.msra.mxu0 %v3894_v8 }
0x1318   :  { %3031 = vmatpush3.msra.mxu1 %v3939_v34  ;;  %3034 = vmatprep.mubr.msk.f32.mxu1 %vm3189_vm0, %v3188_v2  ;;  %v3187_v34 = vld [vmem:[%s4166_s7] ss:$0 sm:$0xff] }
0x1319   :  { %3032 = vmatprep.subr.mxu1 %v3188_v2  ;;  %3021 = vmatprep.subr.mxu0 %v3188_v2 }
0x131a   :  { %3033 = vmatpush3.msra.mxu1 %v3946_v35  ;;  %3022 = vmatpush3.msra.mxu0 %v3908_v3 }
0x131b   :  { %3023 = vmatprep.mubr.msk.f32.mxu0 %vm3189_vm0, %v3188_v2  ;;  %vm2216_vm0 = vcmp.gt.s32.totalorder %v3830_v42, 7  ;;  %v1927_v42 = vsel %vm1747_vm13, %v3986_v40, 0.0 }
0x131c   :  { %v2319_v17 = vsel %vm2216_vm0, 1, %v3190_v11 }
0x13c9   :  { %v2109_v46 = vpop.f32.mrf.mxu1 }
0x13cb   :  { %v2992_v18 = vpop.f32.mrf.mxu1 }
0x13cc   :  { %v1351_v18 = vsel %vm1171_vm9, %v3746_v15, 0.0 }
0x13d2   :  { %v2184_v8 = vpop.f32.mrf.mxu0 }
0x13d3   :  { %v2185_v13 = vadd.f32 %v2184_v8, %v2109_v46  ;;  %v2290_v4 = vpop.f32.mrf.mxu1  ;;  %v775_v46 = vsel %vm595_vm5, %v3576_v62, 0.0 }
0x13d4   :  { %v2294_v9 = vadd.f32 %v2290_v4, %v178_v19  ;;  %v3003_v33 = vpop.f32.mrf.mxu0 }
0x13d5   :  { %v2188_v35 = vadd.f32 %v3187_v34, %v2185_v13  ;;  %v3014_v22 = vpop.f32.mrf.mxu1 }
0x13d6   :  { %3149 = vtanh.f32 %v2294_v9  ;;  %v2617_v58 = vmul.f32 -1.442695, %v2294_v9  ;;  %v1063_v22 = vsel %vm883_vm7, %v3661_v5, 0.0 }
0x13d7   :  { %3151 = vtanh.f32 %v2188_v35  ;;  %v2615_v21 = vmul.f32 -1.442695, %v2188_v35 }
0x13d8   :  { %3153 = vpow2.f32 %v2617_v58 }
0x13d9   :  { %3155 = vpow2.f32 %v2615_v21 }
0x13e3   :  { %v3150_v3 = vpop.eup %3149 }
0x13e4   :  { %v3152_v2 = vpop.eup %3151  ;;  %2304 = vrot.lane.b32.xlu0 %v3150_v3, %s3191_s16  ;;  %v1639_v3 = vsel %vm1459_vm11, %v3836_v6, 0.0 }
0x13e5   :  { %2198 = vrot.lane.b32.xlu1 %v3152_v2, %s3191_s16  ;;  %v3154_v16 = vpop.eup %3153 }
0x13e6   :  { %v3156_v56 = vpop.eup %3155  ;;  %v2298_v23 = vadd.f32 1.0, %v3154_v16 }
0x13e7   :  { %v2192_v24 = vadd.f32 1.0, %v3156_v56 }
0x13e8   :  { %3157 = vrcp.f32 %v2298_v23 }
0x13e9   :  { %3159 = vrcp.f32 %v2192_v24 }
0x13f5   :  { %v3158_v55 = vpop.eup %3157 }
0x13f6   :  { %v3160_v54 = vpop.eup %3159  ;;  %v2302_v59 = vmul.f32 %v3158_v55, %v4051_v29 }
0x13f7   :  { %v2196_v30 = vmul.f32 %v3160_v54, %v1926_v37 }
0x1456   :  { %v2305_v61 = vpop.permute.xlu0 %2304 }
0x1457   :  { %v2307_v25 = vmul.f32 %v3158_v55, %v2305_v61  ;;  %v2199_v26 = vpop.permute.xlu1 %2198 }
0x1458   :  { %v2201_v28 = vmul.f32 %v3160_v54, %v2199_v26 }
0x1459   :  { %2309 = vrot.lane.b32.xlu0 %v2307_v25, %s3192_s17 }
0x145a   :  { %2203 = vrot.lane.b32.xlu1 %v2201_v28, %s3192_s17 }
0x14cb   :  { %v2310_v57 = vpop.permute.xlu0 %2309 }
0x14cc   :  { %v4058_v38 = vadd.f32 %v2310_v57, %v2302_v59  ;;  %v2204_v0 = vpop.permute.xlu1 %2203 }
0x14cd   :  { %v2206_v44 = vadd.f32 %v2204_v0, %v2196_v30 }
0x14ce   :  { %3161 = vtanh.f32 %v4058_v38 }
0x14cf   :  { %3163 = vtanh.f32 %v2206_v44  ;;  %v2214_v4 = vsel %vm2035_vm15, %v2206_v44, %v1926_v37 }
0x14db   :  { %v3162_v60 = vpop.eup %3161 }
0x14dc   :  { %v3164_v53 = vpop.eup %3163  ;;  %2315 = vrot.lane.b32.xlu0 %v3162_v60, %s3191_s16 }
0x14dd   :  { %2209 = vrot.lane.b32.xlu1 %v3164_v53, %s3191_s16 }
0x154e   :  { %v2316_v63 = vpop.permute.xlu0 %2315 }
0x154f   :  { %v2318_v1 = vmul.f32 %v3158_v55, %v2316_v63  ;;  %v2210_v7 = vpop.permute.xlu1 %2209 }
0x1550   :  { %v2212_v36 = vmul.f32 %v3160_v54, %v2210_v7 }
0x1551   :  { %2402 = vrot.lane.b32.xlu0 %v2318_v1, %s3192_s17 }
0x1552   :  { %v4067_v47 = vsel %vm2035_vm15, %v2212_v36, %v3992_v31  ;;  %v2215_v2 = vsel %vm2035_vm15, %v2212_v36, 0.0 }
0x1553   :  { %2327 = vrot.lane.b32.xlu1 %v4067_v47, %s3192_s17 }
0x15c3   :  { %v2403_v12 = vpop.permute.xlu0 %2402 }
0x15c4   :  { %3035 = vmatmul.mubr.msk.f32.vlgmr.msra.gmra.mxu1 %vm51_vm1, %v2403_v12 }
0x15c5   :  { %v2328_v43 = vpop.permute.xlu1 %2327 }
0x15c6   :  { %3024 = vmatmul.mubr.msk.f32.vlgmr.msra.gmra.mxu0 %vm51_vm1, %v2328_v43 }
0x1684   :  { %v2472_v49 = vpop.f32.mrf.mxu1 }
0x1686   :  { %v2397_v39 = vpop.f32.mrf.mxu0  ;;  %v3036_v41 = vpop.f32.mrf.mxu1 }
0x1687   :  { %v2473_v45 = vadd.f32 %v2472_v49, %v2397_v39 }
0x1688   :  { %v3025_v14 = vpop.f32.mrf.mxu0 }
0x1689   :  { %v2476_v48 = vadd.f32 %v3187_v34, %v2473_v45 }
0x168b   :  { %3165 = vtanh.f32 %v2476_v48  ;;  %v2620_v11 = vmul.f32 -1.442695, %v2476_v48 }
0x168d   :  { %3167 = vpow2.f32 %v2620_v11 }
0x1698   :  { %v3166_v31 = vpop.eup %3165 }
0x1699   :  { %2486 = vrot.lane.b32.xlu1 %v3166_v31, %s3191_s16 }
0x169a   :  { %v3168_v19 = vpop.eup %3167 }
0x169b   :  { %v2480_v8 = vadd.f32 1.0, %v3168_v19 }
0x169d   :  { %2321 = vperm.xlu1 %3043, %v2319_v17   ;;  %3169 = vrcp.f32 %v2480_v8 }
0x16a1   :  { %2511 = vrot.lane.b32.xlu1 %v775_v46, %s3192_s17 }
0x16a5   :  { %2515 = vrot.lane.b32.xlu1 %v1351_v18, %s3192_s17 }
0x16a9   :  { %2519 = vrot.lane.b32.xlu1 %v1927_v42, %s3192_s17 }
0x16aa   :  { %v3170_v52 = vpop.eup %3169 }
0x16ab   :  { %v2484_v9 = vmul.f32 %v3170_v52, %v2214_v4 }
0x170b   :  { %v2487_v62 = vpop.permute.xlu1 %2486 }
0x170c   :  { %v2489_v13 = vmul.f32 %v3170_v52, %v2487_v62 }
0x170e   :  { %2491 = vrot.lane.b32.xlu0 %v2489_v13, %s3192_s17 }
0x1718   :  { %v2322_v10 = vpop.permute.xlu1 %2321 }
0x1719   :  { %vm2323_vm2 = vcmp.eq.s32.totalorder %v2322_v10, 1 }
0x171a   :  { %v2324_v58 = vsel %vm2323_vm2, %v2318_v1, %v4003_v20  ;;  %v2325_v32 = vsel %vm2323_vm2, %v4058_v38, %v4051_v29 }
0x171c   :  { %v2512_v15 = vpop.permute.xlu1 %2511 }
0x171d   :  { %2534 = vst.msk [vmem:[%s4167_s8 + $0x8] sm:$0xff] %vm51_vm1, %v2512_v15 }
0x1720   :  { %v2516_v27 = vpop.permute.xlu1 %2515 }
0x1721   :  { %2536 = vst.msk [vmem:[%s4167_s8 + $0x18] sm:$0xff] %vm51_vm1, %v2516_v27 }
0x1724   :  { %v2520_v40 = vpop.permute.xlu1 %2519 }
0x1725   :  { %2538 = vst.msk [vmem:[%s4167_s8 + $0x28] sm:$0xff] %vm51_vm1, %v2520_v40 }
0x1780   :  { %v2492_v33 = vpop.permute.xlu0 %2491 }
0x1781   :  { %v2494_v34 = vadd.f32 %v2492_v33, %v2484_v9 }
0x1783   :  { %3171 = vtanh.f32 %v2494_v34  ;;  %v2502_v16 = vsel %vm2323_vm2, %v2494_v34, %v2214_v4 }
0x1790   :  { %v3172_v35 = vpop.eup %3171 }
0x1791   :  { %2497 = vrot.lane.b32.xlu0 %v3172_v35, %s3191_s16  ;;  %s3193_s16 = smov 96  }
0x1795   :  { %2513 = vrot.lane.b32.xlu0 %v1063_v22, %s3192_s17 }
0x1799   :  { %2517 = vrot.lane.b32.xlu0 %v1639_v3, %s3192_s17 }
0x179d   :  { %2521 = vrot.lane.b32.xlu0 %v2215_v2, %s3192_s17 }
0x17a1   :  { %2543 = vrot.lane.b32.xlu0 %v2324_v58, %s3192_s17 }
0x17a5   :  { %2553 = vrot.lane.b32.xlu0 %v2325_v32, %s3193_s16 }
0x1803   :  { %v2498_v5 = vpop.permute.xlu0 %2497 }
0x1804   :  { %v2500_v50 = vmul.f32 %v3170_v52, %v2498_v5 }
0x1806   :  { %v2503_v6 = vsel %vm2323_vm2, %v2500_v50, 0.0  ;;  %v2501_v20 = vsel %vm2323_vm2, %v2500_v50, %v4067_v47 }
0x1807   :  { %2523 = vrot.lane.b32.xlu1 %v2503_v6, %s3192_s17  ;;  %v2514_v51 = vpop.permute.xlu0 %2513 }
0x1808   :  { %2535 = vst.msk [vmem:[%s4167_s8 + $0x10] sm:$0xff] %vm51_vm1, %v2514_v51 }
0x180b   :  { %2545 = vrot.lane.b32.xlu1 %v2501_v20, %s3192_s17  ;;  %v2518_v21 = vpop.permute.xlu0 %2517 }
0x180c   :  { %2537 = vst.msk [vmem:[%s4167_s8 + $0x20] sm:$0xff] %vm51_vm1, %v2518_v21 }
0x180f   :  { %2555 = vrot.lane.b32.xlu1 %v2502_v16, %s3193_s16  ;;  %v2522_v56 = vpop.permute.xlu0 %2521 }
0x1810   :  { %2539 = vst.msk [vmem:[%s4167_s8 + $0x30] sm:$0xff] %vm51_vm1, %v2522_v56 }
0x1813   :  { %v2544_v23 = vpop.permute.xlu0 %2543 }
0x1814   :  { %2549 = vst.msk [vmem:[%s4168_s9] sm:$0xff] %vm51_vm1, %v2544_v23 }
0x1817   :  { %v2554_v24 = vpop.permute.xlu0 %2553 }
0x1818   :  { %2559 = vst.msk [vmem:[%s4169_s10] sm:$0xff] %vm51_vm1, %v2554_v24 }
0x1879   :  { %v2524_v55 = vpop.permute.xlu1 %2523 }
0x187a   :  { %2540 = vst.msk [vmem:[%s4167_s8 + $0x38] sm:$0xff] %vm51_vm1, %v2524_v55 }
0x187d   :  { %v2546_v61 = vpop.permute.xlu1 %2545 }
0x187e   :  { %2550 = vst.msk [vmem:[%s4168_s9 + $0x8] sm:$0xff] %vm51_vm1, %v2546_v61 }
0x1881   :  { %v2556_v54 = vpop.permute.xlu1 %2555 }
0x1882   :  { %2560 = vst.msk [vmem:[%s4169_s10 + $0x8] sm:$0xff] %vm51_vm1, %v2556_v54 }

</bundles_post_ra>
